<compile_context>
chip_gen: v7x
topology: tpu7x:2x2x1
jax: 0.10.0
libtpu: 0.0.40
codegen_flags: <defaults>
</compile_context>

<pallas_src>
import functools
import math

import numpy as np

import jax
import jax.numpy as jnp
from jax.experimental import pallas as pl
from jax.experimental.pallas import tpu as pltpu

_LANE = 128


def _round_up(x, m):
    return ((x + m - 1) // m) * m


def _num_tensorcores():
    """Best-effort TensorCore count (v7x reports 2; v5e/v6e report 1)."""
    try:
        info = pltpu.get_tpu_info()
    except Exception:
        return 1
    for name in ("num_tensorcores", "tensorcore_count", "num_cores",
                 "core_count", "num_cores_per_chip"):
        val = getattr(info, name, None)
        if isinstance(val, int) and val > 0:
            return val
    return 1


def _mhsa_kernel(x_ref, wq_ref, wk_ref, wv_ref, bias_ref, o_ref, *,
                 rows_per_block, seq, group_rows, num_heads, head_dim,
                 matmul_dtype, approx_recip):
    A = num_heads * head_dim
    R = group_rows
    n_groups = rows_per_block // R

    # Resident operands (already in matmul_dtype; scale folded into W_q).
    wq = wq_ref[...]                       # (D, A)
    wk = wk_ref[...]
    wv = wv_ref[...]
    bias = bias_ref[...]                   # (R, R) f32: 0 on-block, -1e30 off-block

    # Static per-head lane masks over the attention dim (kept in f32 so the
    # masking multiply is plain f32 VPU work on v5e; cast to MXU dtype last).
    if num_heads > 1:
        lane = jax.lax.broadcasted_iota(jnp.int32, (1, A), 1)
        head_masks = [
            jnp.logical_and(lane >= h * head_dim,
                            lane < (h + 1) * head_dim).astype(jnp.float32)
            for h in range(num_heads)
        ]

    def group_body(g, carry):
        r0 = pl.multiple_of(g * R, R)
        xg = x_ref[pl.ds(r0, R), :]                      # (R, D) f32 (residual source)
        xg_m = xg.astype(matmul_dtype)

        # Q/K/V projections for this packed group: three well-shaped MXU
        # matmuls against separate resident weights (no lane-offset slices).
        q = jax.lax.dot_general(xg_m, wq, (((1,), (0,)), ((), ())),
                                preferred_element_type=jnp.float32)   # (R, A)
        k = jax.lax.dot_general(xg_m, wk, (((1,), (0,)), ((), ())),
                                preferred_element_type=jnp.float32)
        v = jax.lax.dot_general(xg_m, wv, (((1,), (0,)), ((), ())),
                                preferred_element_type=jnp.float32)
        q_m = q.astype(matmul_dtype)

        out = jnp.zeros((R, A), jnp.float32)
        for h in range(num_heads):                       # static, small head count
            if num_heads > 1:
                kh = (k * head_masks[h]).astype(matmul_dtype)
                vh = (v * head_masks[h]).astype(matmul_dtype)
            else:
                kh = k.astype(matmul_dtype)
                vh = v.astype(matmul_dtype)

            # Lane-dense (R, R) scores: single MXU matmul per group/head; the
            # masked lanes of other heads contribute exact zeros.
            s = jax.lax.dot_general(q_m, kh, (((1,), (1,)), ((), ())),
                                    preferred_element_type=jnp.float32)
            s = s + bias                                 # block-diagonal batch mask
            s_max = jnp.max(s, axis=-1, keepdims=True)
            p = jnp.exp(s - s_max)                       # off-block -> exactly 0
            denom = jnp.sum(p, axis=-1, keepdims=True)
            p = p * pl.reciprocal(denom, approx=approx_recip)   # EUP, no VALU divide
            out = out + jax.lax.dot_general(
                p.astype(matmul_dtype), vh, (((1,), (0,)), ((), ())),
                preferred_element_type=jnp.float32)

        # Residual (input_dim == attention_dim -> W_res is None) + ReLU in f32.
        out = jnp.maximum(out + xg, 0.0)
        o_ref[pl.ds(r0, R), :] = out.astype(o_ref.dtype)
        return carry

    jax.lax.fori_loop(0, n_groups, group_body, 0)


def multi_head_self_attention(x, wq, wk, wv, *, num_heads=1, use_scale=False,
                              block_batch=None, matmul_dtype=jnp.float32,
                              approx_recip=True):
    """x: (B, F, D) f32; wq/wk/wv: (D, A) stored pre-transposed (kernel does x @ W)."""
    B, F, D = x.shape
    A = wq.shape[1]
    assert A % num_heads == 0, "attention_dim not divisible by num_heads"
    assert A == D, "kernel covers the default attention_dim == input_dim case (W_res is None)"
    head_dim = A // num_heads

    # Fold 1/sqrt(head_dim) into W_q (commutes exactly through the projection)
    # and pre-cast all resident weights to the MXU operand dtype.
    if use_scale:
        wq = wq * jnp.float32(1.0 / math.sqrt(float(head_dim)))
    wq_m = wq.astype(matmul_dtype)
    wk_m = wk.astype(matmul_dtype)
    wv_m = wv.astype(matmul_dtype)

    # ---- packed-group geometry ----------------------------------------------
    if F >= _LANE:
        G = 1
    else:
        G = max(1, _LANE // F)
        while G > 1 and (G * F) % 8 != 0:      # keep group rows sublane-aligned
            G -= 1
    R = G * F                                  # rows per packed score block
    assert R <= 1024, "TODO(synk): flash-style KV tiling for long sequences"
    unit = G * (8 // math.gcd(8, G * F))       # bt granularity (group + sublane aligned)

    # Additive block-diagonal bias (0 within a batch element, -1e30 across);
    # built host-side, resident in VMEM across all grid steps.
    bid = np.arange(R, dtype=np.int32) // F
    bias = jnp.asarray(
        np.where(bid[:, None] == bid[None, :], 0.0, -1e30).astype(np.float32))

    # ---- batch-tile selection -------------------------------------------------
    # Big tiles amortize per-step overhead/DMA ramp; the lane-padded (D,A=32 ->
    # 128 lanes) double-buffered x/out blocks are capped by an explicit VMEM
    # budget that is safe on v5e/v6e and v7x (64 MiB physical / 32 MiB scoped).
    in_row_b = _round_up(D, _LANE) * 4
    out_row_b = _round_up(A, _LANE) * 4
    vmem_rows_cap = (16 << 20) // (2 * (in_row_b + out_row_b))
    target_rows = min(4096, vmem_rows_cap)
    if block_batch is not None:
        bt = _round_up(max(1, int(block_batch)), unit)
    else:
        bt = max(unit, (target_rows // max(F, 1)) // unit * unit)
    bt = min(bt, _round_up(B, unit))
    # Only split a single full-batch tile when the part has >1 TensorCore (v7x).
    if _num_tensorcores() >= 2 and B > unit and pl.cdiv(B, bt) < 2:
        bt = _round_up(pl.cdiv(B, 2), unit)
    Bp = _round_up(B, bt)
    grid = Bp // bt
    rows_per_block = bt * F

    # 2-D lane-contiguous view (layout-identical to the 3-D tensor).  Padded
    # batch rows are zeros; the block-diagonal mask keeps them self-contained
    # (their output is 0) and they are sliced off below.
    x2 = x.reshape(B * F, D)
    if Bp != B:
        x2 = jnp.pad(x2, ((0, (Bp - B) * F), (0, 0)))

    rows_total = Bp * F
    w_itemsize = jnp.dtype(matmul_dtype).itemsize
    cost = pl.CostEstimate(
        flops=2 * rows_total * D * 3 * A + num_heads * 4 * rows_total * R * A,
        transcendentals=num_heads * rows_total * R,
        bytes_accessed=4 * rows_total * (D + A) + 3 * D * A * w_itemsize + 4 * R * R,
    )

    blk_bytes = 2 * rows_per_block * (in_row_b + out_row_b)       # double-buffered x/out
    const_bytes = 2 * (3 * D * _round_up(A, _LANE) * w_itemsize + 4 * R * _round_up(R, _LANE))
    vmem_limit = int(min(blk_bytes + const_bytes + (10 << 20), 32 << 20))

    kernel = functools.partial(
        _mhsa_kernel, rows_per_block=rows_per_block, seq=F, group_rows=R,
        num_heads=num_heads, head_dim=head_dim, matmul_dtype=matmul_dtype,
        approx_recip=approx_recip)

    out2 = pl.pallas_call(
        kernel,
        out_shape=jax.ShapeDtypeStruct((Bp * F, A), x.dtype),
        grid_spec=pltpu.PrefetchScalarGridSpec(
            num_scalar_prefetch=0,
            grid=(grid,),
            in_specs=[
                pl.BlockSpec((rows_per_block, D), lambda i: (i, 0)),   # X batch tile
                pl.BlockSpec((D, A), lambda i: (0, 0)),                # W_q (resident)
                pl.BlockSpec((D, A), lambda i: (0, 0)),                # W_k (resident)
                pl.BlockSpec((D, A), lambda i: (0, 0)),                # W_v (resident)
                pl.BlockSpec((R, R), lambda i: (0, 0)),                # block-diag bias
            ],
            out_specs=pl.BlockSpec((rows_per_block, A), lambda i: (i, 0)),
        ),
        compiler_params=pltpu.CompilerParams(
            dimension_semantics=("parallel",),
            vmem_limit_bytes=vmem_limit,
        ),
        cost_estimate=cost,
    )(x2, wq_m, wk_m, wv_m, bias)

    return out2[: B * F].reshape(B, F, A)


def _reference(x, wq, wk, wv, *, num_heads, use_scale=False):
    """Pure-JAX reference mirroring the PyTorch forward."""
    B, F, D = x.shape
    A = wq.shape[1]
    hd = A // num_heads
    q = (x @ wq).reshape(B, F, num_heads, hd).transpose(0, 2, 1, 3)
    k = (x @ wk).reshape(B, F, num_heads, hd).transpose(0, 2, 1, 3)
    v = (x @ wv).reshape(B, F, num_heads, hd).transpose(0, 2, 1, 3)
    scores = jnp.einsum("bhqd,bhkd->bhqk", q, k)
    if use_scale:
        scores = scores / (hd ** 0.5)
    attn = jax.nn.softmax(scores, axis=-1)
    out = jnp.einsum("bhqk,bhkd->bhqd", attn, v)
    out = out.transpose(0, 2, 1, 3).reshape(B, F, A)
    out = out + x
    return jax.nn.relu(out)


if __name__ == "__main__":
    # AutoInt-style shapes: 8 fields x 32-dim embeddings, attention_dim=32, 2 heads.
    B, F, D = 64, 8, 32
    num_heads = 2

    key = jax.random.PRNGKey(0)
    kx, kq, kk, kv = jax.random.split(key, 4)

    x = jax.random.normal(kx, (B, F, D), dtype=jnp.float32)
    bound = 1.0 / (D ** 0.5)     # nn.Linear-style init, stored as [D, A]
    wq = jax.random.uniform(kq, (D, D), jnp.float32, -bound, bound)
    wk = jax.random.uniform(kk, (D, D), jnp.float32, -bound, bound)
    wv = jax.random.uniform(kv, (D, D), jnp.float32, -bound, bound)

    # f32-operand path, module defaults (use_scale=False), exact reciprocal.
    out = jax.block_until_ready(
        multi_head_self_attention(x, wq, wk, wv, num_heads=num_heads,
                                  use_scale=False, matmul_dtype=jnp.float32,
                                  approx_recip=False))
    ref = _reference(x, wq, wk, wv, num_heads=num_heads, use_scale=False)
    assert out.shape == (B, F, D)
    assert jnp.allclose(out, ref, atol=1e-2, rtol=1e-2), "f32 path mismatch vs reference"

    # bf16 MXU-operand path (f32 accumulation), scaled attention, approx recip.
    out_bf = jax.block_until_ready(
        multi_head_self_attention(x, wq, wk, wv, num_heads=num_heads,
                                  use_scale=True, matmul_dtype=jnp.bfloat16,
                                  approx_recip=True))
    ref_s = _reference(x, wq, wk, wv, num_heads=num_heads, use_scale=True)
    assert jnp.allclose(out_bf, ref_s, atol=5e-2, rtol=5e-2), "bf16 path mismatch vs reference"

    print("KERNEL_OK")
</pallas_src>

<mosaic_0001>
module attributes {stable_mosaic.version = 11 : i64} {
  func.func @_mhsa_kernel(%arg0: i32, %arg1: memref<512x32xf32, #tpu.memory_space<vmem>>, %arg2: memref<32x32xf32, #tpu.memory_space<vmem>>, %arg3: memref<32x32xf32, #tpu.memory_space<vmem>>, %arg4: memref<32x32xf32, #tpu.memory_space<vmem>>, %arg5: memref<128x128xf32, #tpu.memory_space<vmem>>, %arg6: memref<512x32xf32, #tpu.memory_space<vmem>>) attributes {dimension_semantics = [#tpu.dimension_semantics<parallel>], iteration_bounds = array<i64: 1>, scalar_prefetch = 0 : i64, scratch_operands = 0 : i64, tpu.core_type = #tpu.core_type<tc>, window_params = [{transform_indices = @transform_0, window_bounds = array<i64: 512, 32>}, {pipeline_mode = #tpu.pipeline_mode<synchronous>, transform_indices = @transform_1, window_bounds = array<i64: 32, 32>}, {pipeline_mode = #tpu.pipeline_mode<synchronous>, transform_indices = @transform_2, window_bounds = array<i64: 32, 32>}, {pipeline_mode = #tpu.pipeline_mode<synchronous>, transform_indices = @transform_3, window_bounds = array<i64: 32, 32>}, {pipeline_mode = #tpu.pipeline_mode<synchronous>, transform_indices = @transform_4, window_bounds = array<i64: 128, 128>}, {transform_indices = @transform_5, window_bounds = array<i64: 512, 32>}]} {
    %c0 = arith.constant 0 : index
    %c0_0 = arith.constant 0 : index
    %0 = vector.load %arg2[%c0, %c0_0] : memref<32x32xf32, #tpu.memory_space<vmem>>, vector<32x32xf32>
    %c0_1 = arith.constant 0 : index
    %c0_2 = arith.constant 0 : index
    %1 = vector.load %arg3[%c0_1, %c0_2] : memref<32x32xf32, #tpu.memory_space<vmem>>, vector<32x32xf32>
    %c0_3 = arith.constant 0 : index
    %c0_4 = arith.constant 0 : index
    %2 = vector.load %arg4[%c0_3, %c0_4] : memref<32x32xf32, #tpu.memory_space<vmem>>, vector<32x32xf32>
    %c0_5 = arith.constant 0 : index
    %c0_6 = arith.constant 0 : index
    %3 = vector.load %arg5[%c0_5, %c0_6] : memref<128x128xf32, #tpu.memory_space<vmem>>, vector<128x128xf32>
    %4 = tpu.iota {dimensions = array<i32: 1>} : vector<1x32xi32>
    %c0_i32 = arith.constant 0 : i32
    %5 = vector.broadcast %c0_i32 : i32 to vector<1x32xi32>
    %6 = arith.cmpi sge, %4, %5 : vector<1x32xi32>
    %c16_i32 = arith.constant 16 : i32
    %7 = vector.broadcast %c16_i32 : i32 to vector<1x32xi32>
    %8 = arith.cmpi slt, %4, %7 : vector<1x32xi32>
    %9 = arith.andi %6, %8 : vector<1x32xi1>
    %10 = arith.extui %9 : vector<1x32xi1> to vector<1x32xi32>
    %11 = arith.sitofp %10 : vector<1x32xi32> to vector<1x32xf32>
    %c16_i32_7 = arith.constant 16 : i32
    %12 = vector.broadcast %c16_i32_7 : i32 to vector<1x32xi32>
    %13 = arith.cmpi sge, %4, %12 : vector<1x32xi32>
    %c32_i32 = arith.constant 32 : i32
    %14 = vector.broadcast %c32_i32 : i32 to vector<1x32xi32>
    %15 = arith.cmpi slt, %4, %14 : vector<1x32xi32>
    %16 = arith.andi %13, %15 : vector<1x32xi1>
    %17 = arith.extui %16 : vector<1x32xi1> to vector<1x32xi32>
    %18 = arith.sitofp %17 : vector<1x32xi32> to vector<1x32xf32>
    %c0_i32_8 = arith.constant 0 : i32
    %c4_i32 = arith.constant 4 : i32
    %19 = arith.addi %c0_i32_8, %c4_i32 : i32
    %c1_i32 = arith.constant 1 : i32
    scf.for %arg7 = %c0_i32_8 to %19 step %c1_i32  : i32 {
      %c128_i32 = arith.constant 128 : i32
      %20 = arith.muli %arg7, %c128_i32 : i32
      %21 = tpu.assume_multiple %20, 128 : i32
      %22 = arith.index_cast %21 : i32 to index
      %c0_10 = arith.constant 0 : index
      %23 = vector.load %arg1[%22, %c0_10] : memref<512x32xf32, #tpu.memory_space<vmem>>, vector<128x32xf32>
      %cst = arith.constant dense<0.000000e+00> : vector<128x32xf32>
      %24 = tpu.matmul %23, %0, %cst {dimension_numbers = #tpu.dot_dimension_numbers<[1], [0], [0], [1], [0, 0, 1, 1], [], []>} : vector<128x32xf32>, vector<32x32xf32>, vector<128x32xf32> -> vector<128x32xf32>
      %cst_11 = arith.constant dense<0.000000e+00> : vector<128x32xf32>
      %25 = tpu.matmul %23, %1, %cst_11 {dimension_numbers = #tpu.dot_dimension_numbers<[1], [0], [0], [1], [0, 0, 1, 1], [], []>} : vector<128x32xf32>, vector<32x32xf32>, vector<128x32xf32> -> vector<128x32xf32>
      %cst_12 = arith.constant dense<0.000000e+00> : vector<128x32xf32>
      %26 = tpu.matmul %23, %2, %cst_12 {dimension_numbers = #tpu.dot_dimension_numbers<[1], [0], [0], [1], [0, 0, 1, 1], [], []>} : vector<128x32xf32>, vector<32x32xf32>, vector<128x32xf32> -> vector<128x32xf32>
      %cst_13 = arith.constant 0.000000e+00 : f32
      %27 = vector.broadcast %cst_13 : f32 to vector<128x32xf32>
      %28 = vector.broadcast %11 : vector<1x32xf32> to vector<128x32xf32>
      %29 = arith.mulf %25, %28 : vector<128x32xf32>
      %30 = vector.broadcast %11 : vector<1x32xf32> to vector<128x32xf32>
      %31 = arith.mulf %26, %30 : vector<128x32xf32>
      %cst_14 = arith.constant dense<0.000000e+00> : vector<128x128xf32>
      %32 = tpu.matmul %24, %29, %cst_14 {dimension_numbers = #tpu.dot_dimension_numbers<[1], [1], [0], [0], [0, 0, 1, 0], [], []>} : vector<128x32xf32>, vector<128x32xf32>, vector<128x128xf32> -> vector<128x128xf32>
      %33 = arith.addf %32, %3 : vector<128x128xf32>
      %cst_15 = arith.constant dense<0xFF800000> : vector<128xf32>
      %34 = vector.multi_reduction <maximumf>, %33, %cst_15 [1] : vector<128x128xf32> to vector<128xf32>
      %35 = vector.shape_cast %34 : vector<128xf32> to vector<128x1xf32>
      %36 = vector.broadcast %35 : vector<128x1xf32> to vector<128x128xf32>
      %37 = arith.subf %33, %36 : vector<128x128xf32>
      %38 = math.exp %37 : vector<128x128xf32>
      %cst_16 = arith.constant dense<0.000000e+00> : vector<128xf32>
      %39 = vector.multi_reduction <add>, %38, %cst_16 [1] : vector<128x128xf32> to vector<128xf32>
      %40 = vector.shape_cast %39 : vector<128xf32> to vector<128x1xf32>
      %41 = tpu.reciprocal %40 : vector<128x1xf32> -> vector<128x1xf32>
      %42 = vector.broadcast %41 : vector<128x1xf32> to vector<128x128xf32>
      %43 = arith.mulf %38, %42 : vector<128x128xf32>
      %cst_17 = arith.constant dense<0.000000e+00> : vector<128x32xf32>
      %44 = tpu.matmul %43, %31, %cst_17 {dimension_numbers = #tpu.dot_dimension_numbers<[1], [0], [0], [1], [0, 0, 1, 1], [], []>} : vector<128x128xf32>, vector<128x32xf32>, vector<128x32xf32> -> vector<128x32xf32>
      %45 = arith.addf %27, %44 : vector<128x32xf32>
      %46 = vector.broadcast %18 : vector<1x32xf32> to vector<128x32xf32>
      %47 = arith.mulf %25, %46 : vector<128x32xf32>
      %48 = vector.broadcast %18 : vector<1x32xf32> to vector<128x32xf32>
      %49 = arith.mulf %26, %48 : vector<128x32xf32>
      %cst_18 = arith.constant dense<0.000000e+00> : vector<128x128xf32>
      %50 = tpu.matmul %24, %47, %cst_18 {dimension_numbers = #tpu.dot_dimension_numbers<[1], [1], [0], [0], [0, 0, 1, 0], [], []>} : vector<128x32xf32>, vector<128x32xf32>, vector<128x128xf32> -> vector<128x128xf32>
      %51 = arith.addf %50, %3 : vector<128x128xf32>
      %cst_19 = arith.constant dense<0xFF800000> : vector<128xf32>
      %52 = vector.multi_reduction <maximumf>, %51, %cst_19 [1] : vector<128x128xf32> to vector<128xf32>
      %53 = vector.shape_cast %52 : vector<128xf32> to vector<128x1xf32>
      %54 = vector.broadcast %53 : vector<128x1xf32> to vector<128x128xf32>
      %55 = arith.subf %51, %54 : vector<128x128xf32>
      %56 = math.exp %55 : vector<128x128xf32>
      %cst_20 = arith.constant dense<0.000000e+00> : vector<128xf32>
      %57 = vector.multi_reduction <add>, %56, %cst_20 [1] : vector<128x128xf32> to vector<128xf32>
      %58 = vector.shape_cast %57 : vector<128xf32> to vector<128x1xf32>
      %59 = tpu.reciprocal %58 : vector<128x1xf32> -> vector<128x1xf32>
      %60 = vector.broadcast %59 : vector<128x1xf32> to vector<128x128xf32>
      %61 = arith.mulf %56, %60 : vector<128x128xf32>
      %cst_21 = arith.constant dense<0.000000e+00> : vector<128x32xf32>
      %62 = tpu.matmul %61, %49, %cst_21 {dimension_numbers = #tpu.dot_dimension_numbers<[1], [0], [0], [1], [0, 0, 1, 1], [], []>} : vector<128x128xf32>, vector<128x32xf32>, vector<128x32xf32> -> vector<128x32xf32>
      %63 = arith.addf %45, %62 : vector<128x32xf32>
      %64 = arith.addf %63, %23 : vector<128x32xf32>
      %cst_22 = arith.constant 0.000000e+00 : f32
      %65 = vector.broadcast %cst_22 : f32 to vector<128x32xf32>
      %66 = arith.maximumf %64, %65 : vector<128x32xf32>
      %67 = arith.index_cast %21 : i32 to index
      %c0_23 = arith.constant 0 : index
      %68 = vector.load %arg6[%67, %c0_23] : memref<512x32xf32, #tpu.memory_space<vmem>>, vector<128x32xf32>
      tpu.vector_store %arg6[%67, %c0_23], %66 {strides = array<i32>} : memref<512x32xf32, #tpu.memory_space<vmem>>, vector<128x32xf32>,
    }
    %c4_i32_9 = arith.constant 4 : i32
    return
  }
  func.func @transform_0(%arg0: i32) -> (i32, i32) {
    %c0_i32 = arith.constant 0 : i32
    %c0_i32_0 = arith.constant 0 : i32
    return %arg0, %c0_i32 : i32, i32
  }
  func.func @transform_1(%arg0: i32) -> (i32, i32) {
    %c0_i32 = arith.constant 0 : i32
    %c0_i32_0 = arith.constant 0 : i32
    %c0_i32_1 = arith.constant 0 : i32
    return %c0_i32, %c0_i32_0 : i32, i32
  }
  func.func @transform_2(%arg0: i32) -> (i32, i32) {
    %c0_i32 = arith.constant 0 : i32
    %c0_i32_0 = arith.constant 0 : i32
    %c0_i32_1 = arith.constant 0 : i32
    return %c0_i32, %c0_i32_0 : i32, i32
  }
  func.func @transform_3(%arg0: i32) -> (i32, i32) {
    %c0_i32 = arith.constant 0 : i32
    %c0_i32_0 = arith.constant 0 : i32
    %c0_i32_1 = arith.constant 0 : i32
    return %c0_i32, %c0_i32_0 : i32, i32
  }
  func.func @transform_4(%arg0: i32) -> (i32, i32) {
    %c0_i32 = arith.constant 0 : i32
    %c0_i32_0 = arith.constant 0 : i32
    %c0_i32_1 = arith.constant 0 : i32
    return %c0_i32, %c0_i32_0 : i32, i32
  }
  func.func @transform_5(%arg0: i32) -> (i32, i32) {
    %c0_i32 = arith.constant 0 : i32
    %c0_i32_0 = arith.constant 0 : i32
    return %arg0, %c0_i32 : i32, i32
  }
}

</mosaic_0001>

<bundles_post_ra>
// kernel: tpu_custom_call.1
= control target key start
LH: loop header
LB: loop body
LE: loop exit
PB: predicated region body
PF: predicated region fallthrough
CT: control target
= control target key end

     0   :  { %v48_v0 = vlaneseq  ;;  %v2706_v17 = vmov 0.0   ;;  %s2881_s19 = smov 0   ;;  %s3640_s0 = inlined_call_operand.vmem [shape: f32[512,32], index: 0, kind: input, shape index: {}]   ;;  %s3641_s1 = inlined_call_operand.vmem [shape: f32[32,32], index: 1, kind: input, shape index: {}]   ;;  %s3642_s2 = inlined_call_operand.vmem [shape: f32[32,32], index: 2, kind: input, shape index: {}]   ;;  %s3643_s3 = inlined_call_operand.vmem [shape: f32[32,32], index: 3, kind: input, shape index: {}]   ;;  %s3644_s5 = inlined_call_operand.vmem [shape: f32[512,32], index: 5, kind: output, shape index: {}]   ;;  %s3645_s4 = inlined_call_operand.vmem [shape: f32[128,128], index: 4, kind: input, shape index: {}]  }
   0x1   :  { %v2740_v1 = vld [vmem:[%s3641_s1] sm:$0xff]  ;;  %v2745_v2 = vld [vmem:[%s3641_s1 + $0x8] sm:$0xff]  ;;  %v2750_v3 = vld [vmem:[%s3641_s1 + $0x10] sm:$0xff] }
   0x2   :  { %3655 = vst [vmem:[#allocation2_spill] sm:$0xff] %v2740_v1  ;;  %3656 = vst [vmem:[#allocation3_spill] sm:$0xff] %v2745_v2  ;;  %v2755_v4 = vld [vmem:[%s3641_s1 + $0x18] sm:$0xff]  ;;  %v2760_v5 = vld [vmem:[%s3642_s2] sm:$0xff]  ;;  %v49_v7 = vand.u32 127, %v48_v0 }
   0x3   :  { %3657 = vst [vmem:[#allocation4_spill] sm:$0xff] %v2750_v3  ;;  %3658 = vst [vmem:[#allocation5_spill] sm:$0xff] %v2755_v4  ;;  %v2765_v6 = vld [vmem:[%s3642_s2 + $0x8] sm:$0xff]  ;;  %v2770_v8 = vld [vmem:[%s3642_s2 + $0x10] sm:$0xff] }
   0x4   :  { %3659 = vst [vmem:[#allocation6_spill] sm:$0xff] %v2760_v5  ;;  %3660 = vst [vmem:[#allocation7_spill] sm:$0xff] %v2765_v6  ;;  %v2775_v9 = vld [vmem:[%s3642_s2 + $0x18] sm:$0xff]  ;;  %v2780_v10 = vld [vmem:[%s3643_s3] sm:$0xff]  ;;  %vm51_vm0 = vcmp.lt.s32.totalorder %v49_v7, 16  ;;  %vm55_vm1 = vcmp.ge.s32.totalorder %v49_v7, 16 }
   0x5   :  { %3661 = vst [vmem:[#allocation8_spill] sm:$0xff] %v2770_v8  ;;  %3662 = vst [vmem:[#allocation9_spill] sm:$0xff] %v2775_v9  ;;  %v2785_v11 = vld [vmem:[%s3643_s3 + $0x8] sm:$0xff]  ;;  %v2790_v12 = vld [vmem:[%s3643_s3 + $0x10] sm:$0xff]  ;;  %v2812_v18 = vsel %vm51_vm0, 1.0, %v2706_v17  ;;  %vm56_vm2 = vcmp.lt.s32.totalorder %v49_v7, 32 }
   0x6   :  { %3663 = vst [vmem:[#allocation10_spill] sm:$0xff] %v2780_v10  ;;  %3664 = vst [vmem:[#allocation11_spill] sm:$0xff] %v2785_v11  ;;  %v2795_v13 = vld [vmem:[%s3643_s3 + $0x18] sm:$0xff]  ;;  %v2800_v14 = vld [vmem:[%s3645_s4] sm:$0xff] }
   0x7   :  { %3665 = vst [vmem:[#allocation12_spill] sm:$0xff] %v2790_v12  ;;  %3666 = vst [vmem:[#allocation13_spill] sm:$0xff] %v2795_v13  ;;  %v2805_v15 = vld [vmem:[%s3645_s4 + $0x8] sm:$0xff]  ;;  %v2810_v16 = vld [vmem:[%s3645_s4 + $0x10] sm:$0xff] }
   0x8   :  { %3667 = vst [vmem:[#allocation14_spill] sm:$0xff] %v2800_v14  ;;  %3668 = vst [vmem:[#allocation15_spill] sm:$0xff] %v2805_v15  ;;  %v2817_v19 = vld [vmem:[%s3645_s4 + $0x18] sm:$0xff]  ;;  %v2822_v20 = vld [vmem:[%s3645_s4 + $0x20] sm:$0xff] }
   0x9   :  { %3669 = vst [vmem:[#allocation16_spill] sm:$0xff] %v2810_v16  ;;  %3670 = vst [vmem:[#allocation17_spill] sm:$0xff] %v2812_v18  ;;  %v2827_v21 = vld [vmem:[%s3645_s4 + $0x28] sm:$0xff]  ;;  %v2832_v22 = vld [vmem:[%s3645_s4 + $0x30] sm:$0xff] }
   0xa   :  { %3671 = vst [vmem:[#allocation18_spill] sm:$0xff] %v2817_v19  ;;  %3672 = vst [vmem:[#allocation19_spill] sm:$0xff] %v2822_v20  ;;  %v2837_v23 = vld [vmem:[%s3645_s4 + $0x38] sm:$0xff]  ;;  %v2842_v24 = vld [vmem:[%s3645_s4 + $0x40] sm:$0xff] }
   0xb   :  { %3673 = vst [vmem:[#allocation20_spill] sm:$0xff] %v2827_v21  ;;  %3674 = vst [vmem:[#allocation21_spill] sm:$0xff] %v2832_v22  ;;  %v2847_v25 = vld [vmem:[%s3645_s4 + $0x48] sm:$0xff]  ;;  %v2852_v26 = vld [vmem:[%s3645_s4 + $0x50] sm:$0xff] }
   0xc   :  { %3675 = vst [vmem:[#allocation22_spill] sm:$0xff] %v2837_v23  ;;  %v2857_v27 = vld [vmem:[%s3645_s4 + $0x58] sm:$0xff]  ;;  %v2862_v28 = vld [vmem:[%s3645_s4 + $0x60] sm:$0xff]  ;;  %v2867_v29 = vld [vmem:[%s3645_s4 + $0x68] sm:$0xff] }
   0xd   :  { %v2872_v30 = vld [vmem:[%s3645_s4 + $0x70] sm:$0xff]  ;;  %v2877_v31 = vld [vmem:[%s3645_s4 + $0x78] sm:$0xff]  ;;  %vm57_vm3 = vmand %vm55_vm1, %vm56_vm2 }
   0xe   :  { %v2879_v32 = vsel %vm57_vm3, 1.0, %v2706_v17 }
   0xf LB: > { %v3683_v15 = vld [vmem:[#allocation15_spill] sm:$0xff]  ;;  %v3684_v14 = vld [vmem:[#allocation14_spill] sm:$0xff]  ;;  %v3687_v8 = vld [vmem:[#allocation8_spill] sm:$0xff]  ;;  %s1708_s4 = sshll.u32 %s2704_s19, 7  ;;  %vm84_vm4 = vcmask 261120   ;;  %s65_s19 = sadd.s32 1, %s2704_s19   ;;  %s2704_s19 = sphi %s2881_s19, %s65_s19  }
  0x10   : > { %v3681_v18 = vld [vmem:[#allocation17_spill] sm:$0xff]  ;;  %v3682_v16 = vld [vmem:[#allocation16_spill] sm:$0xff]  ;;  %v3685_v5 = vld [vmem:[#allocation6_spill] sm:$0xff]  ;;  %s2900_s21 = scalar_lea.vmem %s3640_s0, %s1708_s4  ;;  %s3588_s24 = scalar_lea.vmem %s3644_s5, %s1708_s4 }
  0x11   : > { %v3679_v20 = vld [vmem:[#allocation19_spill] sm:$0xff]  ;;  %v3680_v19 = vld [vmem:[#allocation18_spill] sm:$0xff]  ;;  %v3688_v9 = vld [vmem:[#allocation9_spill] sm:$0xff]  ;;  %p62_p0 = scmp.ge.s32.totalorder %s65_s19, 4  }
  0x12   : > { %v3677_v22 = vld [vmem:[#allocation21_spill] sm:$0xff]  ;;  %v3678_v21 = vld [vmem:[#allocation20_spill] sm:$0xff]  ;;  %v3686_v6 = vld [vmem:[#allocation7_spill] sm:$0xff]  ;;  %v2341_v34 = vpack.c.bf16 %v3688_v9, %v3687_v8 }
  0x13   : > { %v3676_v23 = vld [vmem:[#allocation22_spill] sm:$0xff]  ;;  %v2337_v33 = vpack.c.bf16 %v3686_v6, %v3685_v5  ;;  %v3690_v2 = vld [vmem:[#allocation3_spill] sm:$0xff]  ;;  %v3691_v3 = vld [vmem:[#allocation4_spill] sm:$0xff] }
  0x14   : > { %v3689_v1 = vld [vmem:[#allocation2_spill] sm:$0xff]  ;;  %v3692_v4 = vld [vmem:[#allocation5_spill] sm:$0xff]  ;;  %v3694_v11 = vld [vmem:[#allocation11_spill] sm:$0xff] }
  0x15   : > { %v2329_v35 = vpack.c.bf16 %v3690_v2, %v3689_v1  ;;  %v2333_v36 = vpack.c.bf16 %v3692_v4, %v3691_v3  ;;  %2338 = vmatprep.subr.bf16.mxu1 %v2337_v33  ;;  %v68_v37 = vld [vmem:[%s2900_s21] sm:$0xff]  ;;  %v69_v39 = vld [vmem:[%s2900_s21 + $0x8] sm:$0xff]  ;;  %v70_v40 = vld [vmem:[%s2900_s21 + $0x10] sm:$0xff] }
  0x16   : > { %2340 = vmatpush3.bf16.msra.mxu1 %v2337_v33  ;;  %v3693_v10 = vld [vmem:[#allocation10_spill] sm:$0xff]  ;;  %2049 = vmatprep.mubr.msk.f32.mxu1 %vm84_vm4, %v68_v37  ;;  %v3695_v12 = vld [vmem:[#allocation12_spill] sm:$0xff]  ;;  %v3696_v13 = vld [vmem:[#allocation13_spill] sm:$0xff] }
  0x17   : > { %2330 = vmatprep.subr.bf16.mxu0 %v2329_v35  ;;  %2342 = vmatprep.subr.bf16.mxu1 %v2341_v34  ;;  %v2345_v38 = vpack.c.bf16 %v3694_v11, %v3693_v10  ;;  %v2349_v41 = vpack.c.bf16 %v3696_v13, %v3695_v12  ;;  %v71_v42 = vld [vmem:[%s2900_s21 + $0x18] sm:$0xff]  ;;  %v72_v43 = vld [vmem:[%s2900_s21 + $0x20] sm:$0xff]  ;;  %v73_v44 = vld [vmem:[%s2900_s21 + $0x28] sm:$0xff] }
  0x18   : > { %2332 = vmatpush3.bf16.msra.mxu0 %v2329_v35  ;;  %2017 = vmatprep.mubr.msk.f32.mxu0 %vm84_vm4, %v68_v37  ;;  %v74_v45 = vld [vmem:[%s2900_s21 + $0x30] sm:$0xff]  ;;  %v75_v46 = vld [vmem:[%s2900_s21 + $0x38] sm:$0xff]  ;;  %v76_v47 = vld [vmem:[%s2900_s21 + $0x40] sm:$0xff] }
  0x19   : > { %2334 = vmatprep.subr.bf16.mxu0 %v2333_v36  ;;  %v77_v48 = vld [vmem:[%s2900_s21 + $0x48] sm:$0xff]  ;;  %v78_v49 = vld [vmem:[%s2900_s21 + $0x50] sm:$0xff]  ;;  %v79_v50 = vld [vmem:[%s2900_s21 + $0x58] sm:$0xff] }
  0x1a   : > { %2344 = vmatpush3.bf16.msra.mxu1 %v2341_v34  ;;  %v80_v51 = vld [vmem:[%s2900_s21 + $0x60] sm:$0xff]  ;;  %v81_v52 = vld [vmem:[%s2900_s21 + $0x68] sm:$0xff]  ;;  %v82_v53 = vld [vmem:[%s2900_s21 + $0x70] sm:$0xff] }
  0x1b   : > { %v83_v54 = vld [vmem:[%s2900_s21 + $0x78] sm:$0xff]  ;;  %vm2980_vm5 = vmpackc.low %vm84_vm4, %vm84_vm4 }
  0x1c   : > { %2336 = vmatpush3.bf16.msra.mxu0 %v2333_v36 }
  0x1d   : > { %2346 = vmatprep.subr.bf16.mxu0 %v2345_v38  ;;  %2050 = vmatmul.mubr.msk.f32.vlgmr.msra.gmra.mrb[0].mxu1 %vm84_vm4, %v69_v39 }
  0x1e   : > { %2052 = vmatprep.mubr.msk.f32.mxu1 %vm84_vm4, %v70_v40 }
  0x1f   : > { %2018 = vmatmul.mubr.msk.f32.vlgmr.msra.gmra.mrb[0].mxu0 %vm84_vm4, %v69_v39 }
  0x20   : > { %2020 = vmatprep.mubr.msk.f32.mxu0 %vm84_vm4, %v70_v40  ;;  %2348 = vmatpush3.bf16.msra.mxu0 %v2345_v38 }
  0x21   : > { %2350 = vmatprep.subr.bf16.mxu0 %v2349_v41  ;;  %2053 = vmatmul.mubr.msk.f32.gmra.mrb[2].mxu1 %vm84_vm4, %v71_v42 }
  0x22   : > { %2055 = vmatprep.mubr.msk.f32.mxu1 %vm84_vm4, %v72_v43 }
  0x23   : > { %2021 = vmatmul.mubr.msk.f32.gmra.mrb[2].mxu0 %vm84_vm4, %v71_v42 }
  0x24   : > { %2023 = vmatprep.mubr.msk.f32.mxu0 %vm84_vm4, %v72_v43  ;;  %2352 = vmatpush3.bf16.msra.mxu0 %v2349_v41 }
  0x25   : > { %2056 = vmatmul.mubr.msk.f32.gmra.mrb[4].mxu1 %vm84_vm4, %v73_v44 }
  0x26   : > { %2058 = vmatprep.mubr.msk.f32.mxu1 %vm84_vm4, %v74_v45 }
  0x27   : > { %2024 = vmatmul.mubr.msk.f32.gmra.mrb[4].mxu0 %vm84_vm4, %v73_v44 }
  0x28   : > { %2026 = vmatprep.mubr.msk.f32.mxu0 %vm84_vm4, %v74_v45 }
  0x29   : > { %2059 = vmatmul.mubr.msk.f32.gmra.mrb[6].mxu1 %vm84_vm4, %v75_v46 }
  0x2a   : > { %2061 = vmatprep.mubr.msk.f32.mxu1 %vm84_vm4, %v76_v47 }
  0x2b   : > { %2027 = vmatmul.mubr.msk.f32.gmra.mrb[6].mxu0 %vm84_vm4, %v75_v46 }
  0x2c   : > { %2029 = vmatprep.mubr.msk.f32.mxu0 %vm84_vm4, %v76_v47 }
  0x2d   : > { %2062 = vmatmul.mubr.msk.f32.gmra.mrb[8].mxu1 %vm84_vm4, %v77_v48 }
  0x2e   : > { %2064 = vmatprep.mubr.msk.f32.mxu1 %vm84_vm4, %v78_v49 }
  0x2f   : > { %2030 = vmatmul.mubr.msk.f32.gmra.mrb[8].mxu0 %vm84_vm4, %v77_v48 }
  0x30   : > { %2032 = vmatprep.mubr.msk.f32.mxu0 %vm84_vm4, %v78_v49 }
  0x31   : > { %2065 = vmatmul.mubr.msk.f32.gmra.mrb[10].mxu1 %vm84_vm4, %v79_v50 }
  0x32   : > { %2067 = vmatprep.mubr.msk.f32.mxu1 %vm84_vm4, %v80_v51 }
  0x33   : > { %2033 = vmatmul.mubr.msk.f32.gmra.mrb[10].mxu0 %vm84_vm4, %v79_v50 }
  0x34   : > { %2035 = vmatprep.mubr.msk.f32.mxu0 %vm84_vm4, %v80_v51 }
  0x35   : > { %2068 = vmatmul.mubr.msk.f32.gmra.mrb[12].mxu1 %vm84_vm4, %v81_v52 }
  0x36   : > { %2070 = vmatprep.mubr.msk.f32.mxu1 %vm84_vm4, %v82_v53 }
  0x37   : > { %2036 = vmatmul.mubr.msk.f32.gmra.mrb[12].mxu0 %vm84_vm4, %v81_v52 }
  0x38   : > { %2038 = vmatprep.mubr.msk.f32.mxu0 %vm84_vm4, %v82_v53 }
  0x39   : > { %2071 = vmatmul.mubr.msk.f32.gmra.mrb[14].mxu1 %vm84_vm4, %v83_v54 }
  0x3b   : > { %2039 = vmatmul.mubr.msk.f32.gmra.mrb[14].mxu0 %vm84_vm4, %v83_v54 }
  0x3c   : > { %2081 = vmatprep.mubr.msk.f32.mxu0 %vm84_vm4, %v68_v37 }
  0x3f   : > { %2082 = vmatmul.mubr.msk.f32.vlgmr.msra.gmra.mrb[16].mxu0 %vm84_vm4, %v69_v39 }
  0x40   : > { %2084 = vmatprep.mubr.msk.f32.mxu0 %vm84_vm4, %v70_v40 }
  0x43   : > { %2085 = vmatmul.mubr.msk.f32.gmra.mrb[18].mxu0 %vm84_vm4, %v71_v42 }
  0x44   : > { %2087 = vmatprep.mubr.msk.f32.mxu0 %vm84_vm4, %v72_v43 }
  0x47   : > { %2088 = vmatmul.mubr.msk.f32.gmra.mrb[20].mxu0 %vm84_vm4, %v73_v44 }
  0x48   : > { %2090 = vmatprep.mubr.msk.f32.mxu0 %vm84_vm4, %v74_v45 }
  0x4b   : > { %2091 = vmatmul.mubr.msk.f32.gmra.mrb[22].mxu0 %vm84_vm4, %v75_v46 }
  0x4c   : > { %2093 = vmatprep.mubr.msk.f32.mxu0 %vm84_vm4, %v76_v47 }
  0x4f   : > { %2094 = vmatmul.mubr.msk.f32.gmra.mrb[24].mxu0 %vm84_vm4, %v77_v48 }
  0x50   : > { %2096 = vmatprep.mubr.msk.f32.mxu0 %vm84_vm4, %v78_v49 }
  0x53   : > { %2097 = vmatmul.mubr.msk.f32.gmra.mrb[26].mxu0 %vm84_vm4, %v79_v50 }
  0x54   : > { %2099 = vmatprep.mubr.msk.f32.mxu0 %vm84_vm4, %v80_v51 }
  0x57   : > { %2100 = vmatmul.mubr.msk.f32.gmra.mrb[28].mxu0 %vm84_vm4, %v81_v52 }
  0x58   : > { %2102 = vmatprep.mubr.msk.f32.mxu0 %vm84_vm4, %v82_v53 }
  0x5b   : > { %2103 = vmatmul.mubr.msk.f32.gmra.mrb[30].mxu0 %vm84_vm4, %v83_v54 }
  0xf0   : > { %v2051_v55 = vpop.f32.mrb[0].mxu1 }
  0xf1   : > { %v569_v57 = vmul.f32 %v2051_v55, %v3681_v18  ;;  %v986_v58 = vmul.f32 %v2051_v55, %v2879_v32  ;;  %v344_v59 = vpop.f32.mrb[1].mxu1 }
  0xf2   : > { %v2970_v56 = vpop.f32.mrb[0].mxu0  ;;  %v568_v61 = vmul.f32 %v3681_v18, %v344_v59  ;;  %v985_v62 = vmul.f32 %v2879_v32, %v344_v59 }
  0xf3   : > { %v199_v60 = vpop.f32.mrb[1].mxu0 }
  0xf4   : > { %2137 = vmatprep.mubr.msk.f32.mxu1 %vm84_vm4, %v199_v60  ;;  %2193 = vmatprep.mubr.msk.f32.mxu0 %vm84_vm4, %v199_v60  ;;  %v2353_v0 = vpack.c.bf16 %v569_v57, %v568_v61  ;;  %v2401_v7 = vpack.c.bf16 %v986_v58, %v985_v62  ;;  %v2054_v17 = vpop.f32.mrb[2].mxu1 }
  0xf5   : > { %v571_v34 = vmul.f32 %v2054_v17, %v3681_v18  ;;  %v988_v35 = vmul.f32 %v2054_v17, %v2879_v32  ;;  %v354_v36 = vpop.f32.mrb[3].mxu1 }
  0xf6   : > { %v2984_v33 = vpop.f32.mrb[2].mxu0  ;;  %2355 = vmatprep.subr.msk.bf16.mxu1 %vm2980_vm5, %v2353_v0  ;;  %2403 = vmatprep.subr.msk.bf16.mxu0 %vm2980_vm5, %v2401_v7  ;;  %v570_v38 = vmul.f32 %v3681_v18, %v354_v36  ;;  %v987_v39 = vmul.f32 %v2879_v32, %v354_v36 }
  0xf7   : > { %v2988_v37 = vpop.f32.mrb[3].mxu0  ;;  %2358 = vmatpush3.bf16.xpose.msk.msra.mxu1 %vm2980_vm5, %v2353_v0  ;;  %2406 = vmatpush3.bf16.xpose.msk.msra.mxu0 %vm2980_vm5, %v2401_v7 }
  0xf8   : > { %v2359_v40 = vpack.c.bf16 %v571_v34, %v570_v38  ;;  %v2407_v41 = vpack.c.bf16 %v988_v35, %v987_v39  ;;  %v2057_v42 = vpop.f32.mrb[4].mxu1 }
  0xf9   : > { %v573_v44 = vmul.f32 %v2057_v42, %v3681_v18  ;;  %v990_v45 = vmul.f32 %v2057_v42, %v2879_v32  ;;  %v364_v46 = vpop.f32.mrb[5].mxu1 }
  0xfa   : > { %v3000_v43 = vpop.f32.mrb[4].mxu0  ;;  %2361 = vmatprep.subr.msk.bf16.mxu1 %vm2980_vm5, %v2359_v40  ;;  %2409 = vmatprep.subr.msk.bf16.mxu0 %vm2980_vm5, %v2407_v41  ;;  %v572_v48 = vmul.f32 %v3681_v18, %v364_v46  ;;  %v989_v49 = vmul.f32 %v2879_v32, %v364_v46 }
  0xfb   : > { %v3004_v47 = vpop.f32.mrb[5].mxu0 }
  0xfc   : > { %v2365_v50 = vpack.c.bf16 %v573_v44, %v572_v48  ;;  %v2413_v51 = vpack.c.bf16 %v990_v45, %v989_v49  ;;  %v2060_v52 = vpop.f32.mrb[6].mxu1 }
  0xfd   : > { %v575_v54 = vmul.f32 %v2060_v52, %v3681_v18  ;;  %v992_v55 = vmul.f32 %v2060_v52, %v2879_v32  ;;  %v374_v57 = vpop.f32.mrb[7].mxu1 }
  0xfe   : > { %v3012_v53 = vpop.f32.mrb[6].mxu0  ;;  %v574_v59 = vmul.f32 %v3681_v18, %v374_v57  ;;  %v991_v60 = vmul.f32 %v2879_v32, %v374_v57 }
  0xff   : > { %v3016_v58 = vpop.f32.mrb[7].mxu0  ;;  %2364 = vmatpush3.bf16.xpose.msk.msra.mxu1 %vm2980_vm5, %v2359_v40  ;;  %2412 = vmatpush3.bf16.xpose.msk.msra.mxu0 %vm2980_vm5, %v2407_v41 }
 0x100   : > { %2367 = vmatprep.subr.msk.bf16.mxu1 %vm2980_vm5, %v2365_v50  ;;  %2415 = vmatprep.subr.msk.bf16.mxu0 %vm2980_vm5, %v2413_v51  ;;  %v2371_v61 = vpack.c.bf16 %v575_v54, %v574_v59  ;;  %v2419_v62 = vpack.c.bf16 %v992_v55, %v991_v60  ;;  %v2063_v0 = vpop.f32.mrb[8].mxu1 }
 0x101   : > { %v577_v17 = vmul.f32 %v2063_v0, %v3681_v18  ;;  %v994_v34 = vmul.f32 %v2063_v0, %v2879_v32  ;;  %v384_v35 = vpop.f32.mrb[9].mxu1 }
 0x102   : > { %v3028_v7 = vpop.f32.mrb[8].mxu0  ;;  %v576_v38 = vmul.f32 %v3681_v18, %v384_v35  ;;  %v993_v39 = vmul.f32 %v2879_v32, %v384_v35 }
 0x103   : > { %v3032_v36 = vpop.f32.mrb[9].mxu0 }
 0x104   : > { %v2377_v40 = vpack.c.bf16 %v577_v17, %v576_v38  ;;  %v2425_v41 = vpack.c.bf16 %v994_v34, %v993_v39  ;;  %v2066_v42 = vpop.f32.mrb[10].mxu1 }
 0x105   : > { %v579_v45 = vmul.f32 %v2066_v42, %v3681_v18  ;;  %v996_v46 = vmul.f32 %v2066_v42, %v2879_v32  ;;  %v394_v48 = vpop.f32.mrb[11].mxu1 }
 0x106   : > { %v3036_v44 = vpop.f32.mrb[10].mxu0  ;;  %v578_v52 = vmul.f32 %v3681_v18, %v394_v48  ;;  %v995_v54 = vmul.f32 %v2879_v32, %v394_v48 }
 0x107   : > { %v3040_v49 = vpop.f32.mrb[11].mxu0  ;;  %2370 = vmatpush3.bf16.xpose.msk.msra.mxu1 %vm2980_vm5, %v2365_v50  ;;  %2418 = vmatpush3.bf16.xpose.msk.msra.mxu0 %vm2980_vm5, %v2413_v51 }
 0x108   : > { %2373 = vmatprep.subr.msk.bf16.mxu1 %vm2980_vm5, %v2371_v61  ;;  %2421 = vmatprep.subr.msk.bf16.mxu0 %vm2980_vm5, %v2419_v62  ;;  %v2383_v55 = vpack.c.bf16 %v579_v45, %v578_v52  ;;  %v2431_v57 = vpack.c.bf16 %v996_v46, %v995_v54  ;;  %v2069_v59 = vpop.f32.mrb[12].mxu1 }
 0x109   : > { %v581_v0 = vmul.f32 %v2069_v59, %v3681_v18  ;;  %v998_v17 = vmul.f32 %v2069_v59, %v2879_v32  ;;  %v404_v34 = vpop.f32.mrb[13].mxu1 }
 0x10a   : > { %v3052_v60 = vpop.f32.mrb[12].mxu0  ;;  %v580_v51 = vmul.f32 %v3681_v18, %v404_v34  ;;  %v997_v35 = vmul.f32 %v2879_v32, %v404_v34 }
 0x10b   : > { %v3056_v50 = vpop.f32.mrb[13].mxu0 }
 0x10c   : > { %v3060_v38 = vpack.c.bf16 %v581_v0, %v580_v51  ;;  %v3062_v39 = vpack.c.bf16 %v998_v17, %v997_v35  ;;  %v2072_v42 = vpop.f32.mrb[14].mxu1 }
 0x10d   : > { %v583_v46 = vmul.f32 %v2072_v42, %v3681_v18  ;;  %v1000_v48 = vmul.f32 %v2072_v42, %v2879_v32  ;;  %v414_v52 = vpop.f32.mrb[15].mxu1 }
 0x10e   : > { %v3064_v45 = vpop.f32.mrb[14].mxu0  ;;  %v582_v59 = vmul.f32 %v3681_v18, %v414_v52  ;;  %v999_v1 = vmul.f32 %v2879_v32, %v414_v52 }
 0x10f   : > { %v3068_v54 = vpop.f32.mrb[15].mxu0  ;;  %2376 = vmatpush3.bf16.xpose.msk.msra.mxu1 %vm2980_vm5, %v2371_v61  ;;  %2424 = vmatpush3.bf16.xpose.msk.msra.mxu0 %vm2980_vm5, %v2419_v62 }
 0x110   : > { %2379 = vmatprep.subr.msk.bf16.mxu1 %vm2980_vm5, %v2377_v40  ;;  %2427 = vmatprep.subr.msk.bf16.mxu0 %vm2980_vm5, %v2425_v41  ;;  %v3080_v0 = vpack.c.bf16 %v583_v46, %v582_v59  ;;  %v3082_v17 = vpack.c.bf16 %v1000_v48, %v999_v1 }
 0x112   : > { %v2083_v34 = vpop.f32.mrb[16].mxu0 }
 0x113   : > { %v585_v51 = vmul.f32 %v2083_v34, %v3681_v18  ;;  %v1002_v35 = vmul.f32 %v2083_v34, %v2879_v32  ;;  %v489_v42 = vpop.f32.mrb[17].mxu0 }
 0x114   : > { %v584_v61 = vmul.f32 %v3681_v18, %v489_v42  ;;  %v1001_v62 = vmul.f32 %v2879_v32, %v489_v42 }
 0x116   : > { %v3088_v52 = vpack.c.bf16 %v1002_v35, %v1001_v62  ;;  %v3090_v2 = vpack.c.bf16 %v585_v51, %v584_v61  ;;  %v2086_v3 = vpop.f32.mrb[18].mxu0 }
 0x117   : > { %v587_v46 = vmul.f32 %v2086_v3, %v3681_v18  ;;  %v1004_v1 = vmul.f32 %v2086_v3, %v2879_v32  ;;  %v499_v48 = vpop.f32.mrb[19].mxu0  ;;  %2382 = vmatpush3.bf16.xpose.msk.msra.mxu1 %vm2980_vm5, %v2377_v40  ;;  %2430 = vmatpush3.bf16.xpose.msk.msra.mxu0 %vm2980_vm5, %v2425_v41 }
 0x118   : > { %v586_v59 = vmul.f32 %v3681_v18, %v499_v48  ;;  %v1003_v4 = vmul.f32 %v2879_v32, %v499_v48  ;;  %2385 = vmatprep.subr.msk.bf16.mxu1 %vm2980_vm5, %v2383_v55  ;;  %2433 = vmatprep.subr.msk.bf16.mxu0 %vm2980_vm5, %v2431_v57 }
 0x11a   : > { %v3104_v34 = vpack.c.bf16 %v1004_v1, %v1003_v4  ;;  %v3106_v3 = vpack.c.bf16 %v587_v46, %v586_v59  ;;  %v2089_v51 = vpop.f32.mrb[20].mxu0 }
 0x11b   : > { %v589_v35 = vmul.f32 %v2089_v51, %v3681_v18  ;;  %v1006_v42 = vmul.f32 %v2089_v51, %v2879_v32  ;;  %v509_v61 = vpop.f32.mrb[21].mxu0 }
 0x11c   : > { %v588_v40 = vmul.f32 %v3681_v18, %v509_v61  ;;  %v1005_v41 = vmul.f32 %v2879_v32, %v509_v61 }
 0x11e   : > { %v3112_v62 = vpack.c.bf16 %v1006_v42, %v1005_v41  ;;  %v3114_v48 = vpack.c.bf16 %v589_v35, %v588_v40  ;;  %v2092_v5 = vpop.f32.mrb[22].mxu0 }
 0x11f   : > { %v591_v4 = vmul.f32 %v2092_v5, %v3681_v18  ;;  %v1008_v46 = vmul.f32 %v2092_v5, %v2879_v32  ;;  %v519_v1 = vpop.f32.mrb[23].mxu0  ;;  %2388 = vmatpush3.bf16.xpose.msk.msra.mxu1 %vm2980_vm5, %v2383_v55  ;;  %2436 = vmatpush3.bf16.xpose.msk.msra.mxu0 %vm2980_vm5, %v2431_v57 }
 0x120   : > { %v590_v59 = vmul.f32 %v3681_v18, %v519_v1  ;;  %v1007_v6 = vmul.f32 %v2879_v32, %v519_v1  ;;  %2391 = vmatprep.subr.msk.bf16.mxu1 %vm2980_vm5, %v3060_v38  ;;  %2439 = vmatprep.subr.msk.bf16.mxu0 %vm2980_vm5, %v3062_v39 }
 0x122   : > { %v3130_v5 = vpack.c.bf16 %v1008_v46, %v1007_v6  ;;  %v3132_v51 = vpack.c.bf16 %v591_v4, %v590_v59  ;;  %v2095_v35 = vpop.f32.mrb[24].mxu0 }
 0x123   : > { %v593_v42 = vmul.f32 %v2095_v35, %v3681_v18  ;;  %v1010_v55 = vmul.f32 %v2095_v35, %v2879_v32  ;;  %v529_v61 = vpop.f32.mrb[25].mxu0 }
 0x124   : > { %v592_v57 = vmul.f32 %v3681_v18, %v529_v61  ;;  %v1009_v40 = vmul.f32 %v2879_v32, %v529_v61 }
 0x126   : > { %v3138_v41 = vpack.c.bf16 %v1010_v55, %v1009_v40  ;;  %v3140_v1 = vpack.c.bf16 %v593_v42, %v592_v57  ;;  %v2098_v8 = vpop.f32.mrb[26].mxu0 }
 0x127   : > { %v595_v6 = vmul.f32 %v2098_v8, %v3681_v18  ;;  %v1012_v4 = vmul.f32 %v2098_v8, %v2879_v32  ;;  %v539_v46 = vpop.f32.mrb[27].mxu0  ;;  %2394 = vmatpush3.bf16.xpose.msk.msra.mxu1 %vm2980_vm5, %v3060_v38  ;;  %2442 = vmatpush3.bf16.xpose.msk.msra.mxu0 %vm2980_vm5, %v3062_v39 }
 0x128   : > { %v594_v59 = vmul.f32 %v3681_v18, %v539_v46  ;;  %v1011_v9 = vmul.f32 %v2879_v32, %v539_v46  ;;  %2397 = vmatprep.subr.msk.bf16.mxu1 %vm2980_vm5, %v3080_v0  ;;  %2445 = vmatprep.subr.msk.bf16.mxu0 %vm2980_vm5, %v3082_v17 }
 0x12a   : > { %v3158_v8 = vpack.c.bf16 %v1012_v4, %v1011_v9  ;;  %v3160_v35 = vpack.c.bf16 %v595_v6, %v594_v59  ;;  %v2101_v42 = vpop.f32.mrb[28].mxu0 }
 0x12b   : > { %v597_v55 = vmul.f32 %v2101_v42, %v3681_v18  ;;  %v1014_v38 = vmul.f32 %v2101_v42, %v2879_v32  ;;  %v549_v61 = vpop.f32.mrb[29].mxu0 }
 0x12c   : > { %v596_v39 = vmul.f32 %v3681_v18, %v549_v61  ;;  %v1013_v57 = vmul.f32 %v2879_v32, %v549_v61 }
 0x12e   : > { %v3166_v40 = vpack.c.bf16 %v1014_v38, %v1013_v57  ;;  %v3168_v46 = vpack.c.bf16 %v597_v55, %v596_v39  ;;  %v2104_v10 = vpop.f32.mrb[30].mxu0 }
 0x12f   : > { %v599_v9 = vmul.f32 %v2104_v10, %v3681_v18  ;;  %v1016_v6 = vmul.f32 %v2104_v10, %v2879_v32  ;;  %v559_v4 = vpop.f32.mrb[31].mxu0  ;;  %2400 = vmatpush3.bf16.xpose.msk.msra.mxu1 %vm2980_vm5, %v3080_v0  ;;  %2448 = vmatpush3.bf16.xpose.msk.msra.mxu0 %vm2980_vm5, %v3082_v17 }
 0x130   : > { %v598_v59 = vmul.f32 %v3681_v18, %v559_v4  ;;  %v1015_v11 = vmul.f32 %v2879_v32, %v559_v4  ;;  %2450 = vmatprep.subr.bf16.mxu1 %v3088_v52  ;;  %2482 = vmatprep.subr.bf16.mxu0 %v3090_v2 }
 0x132   : > { %v2477_v42 = vpack.c.bf16 %v1016_v6, %v1015_v11  ;;  %v3181_v55 = vpack.c.bf16 %v599_v9, %v598_v59 }
 0x136   : > { %2138 = vmatmul.mubr.msk.f32.vlgmr.msra.gmra.mrb[16].mxu1 %vm84_vm4, %v2970_v56  ;;  %2194 = vmatmul.mubr.msk.f32.vlgmr.msra.gmra.mrb[32].mxu0 %vm84_vm4, %v2970_v56 }
 0x137   : > { %2140 = vmatprep.mubr.msk.f32.mxu1 %vm84_vm4, %v2988_v37  ;;  %2196 = vmatprep.mubr.msk.f32.mxu0 %vm84_vm4, %v2988_v37 }
 0x138   : > { %2452 = vmatpush3.bf16.msra.mxu1 %v3088_v52  ;;  %2484 = vmatpush3.bf16.msra.mxu0 %v3090_v2 }
 0x139   : > { %2454 = vmatprep.subr.bf16.mxu1 %v3104_v34  ;;  %2486 = vmatprep.subr.bf16.mxu0 %v3106_v3 }
 0x13a   : > { %2141 = vmatmul.mubr.msk.f32.gmra.mrb[18].mxu1 %vm84_vm4, %v2984_v33  ;;  %2197 = vmatmul.mubr.msk.f32.gmra.mrb[34].mxu0 %vm84_vm4, %v2984_v33 }
 0x13b   : > { %2199 = vmatprep.mubr.msk.f32.mxu0 %vm84_vm4, %v3004_v47  ;;  %2143 = vmatprep.mubr.msk.f32.mxu1 %vm84_vm4, %v3004_v47 }
 0x13c   : > { %2456 = vmatpush3.bf16.msra.mxu1 %v3104_v34  ;;  %2488 = vmatpush3.bf16.msra.mxu0 %v3106_v3 }
 0x13d   : > { %2458 = vmatprep.subr.bf16.mxu1 %v3112_v62  ;;  %2490 = vmatprep.subr.bf16.mxu0 %v3114_v48 }
 0x13e   : > { %2200 = vmatmul.mubr.msk.f32.gmra.mrb[36].mxu0 %vm84_vm4, %v3000_v43  ;;  %2144 = vmatmul.mubr.msk.f32.gmra.mrb[20].mxu1 %vm84_vm4, %v3000_v43 }
 0x13f   : > { %2202 = vmatprep.mubr.msk.f32.mxu0 %vm84_vm4, %v3016_v58  ;;  %2146 = vmatprep.mubr.msk.f32.mxu1 %vm84_vm4, %v3016_v58 }
 0x140   : > { %2460 = vmatpush3.bf16.msra.mxu1 %v3112_v62  ;;  %2492 = vmatpush3.bf16.msra.mxu0 %v3114_v48 }
 0x141   : > { %2462 = vmatprep.subr.bf16.mxu1 %v3130_v5  ;;  %2494 = vmatprep.subr.bf16.mxu0 %v3132_v51 }
 0x142   : > { %2203 = vmatmul.mubr.msk.f32.gmra.mrb[38].mxu0 %vm84_vm4, %v3012_v53  ;;  %2147 = vmatmul.mubr.msk.f32.gmra.mrb[22].mxu1 %vm84_vm4, %v3012_v53 }
 0x143   : > { %2205 = vmatprep.mubr.msk.f32.mxu0 %vm84_vm4, %v3032_v36  ;;  %2149 = vmatprep.mubr.msk.f32.mxu1 %vm84_vm4, %v3032_v36 }
 0x144   : > { %2464 = vmatpush3.bf16.msra.mxu1 %v3130_v5  ;;  %2496 = vmatpush3.bf16.msra.mxu0 %v3132_v51 }
 0x145   : > { %2466 = vmatprep.subr.bf16.mxu1 %v3138_v41  ;;  %2498 = vmatprep.subr.bf16.mxu0 %v3140_v1 }
 0x146   : > { %2206 = vmatmul.mubr.msk.f32.gmra.mrb[40].mxu0 %vm84_vm4, %v3028_v7  ;;  %2150 = vmatmul.mubr.msk.f32.gmra.mrb[24].mxu1 %vm84_vm4, %v3028_v7 }
 0x147   : > { %2208 = vmatprep.mubr.msk.f32.mxu0 %vm84_vm4, %v3040_v49  ;;  %2152 = vmatprep.mubr.msk.f32.mxu1 %vm84_vm4, %v3040_v49 }
 0x148   : > { %2468 = vmatpush3.bf16.msra.mxu1 %v3138_v41  ;;  %2500 = vmatpush3.bf16.msra.mxu0 %v3140_v1 }
 0x149   : > { %2470 = vmatprep.subr.bf16.mxu1 %v3158_v8  ;;  %2502 = vmatprep.subr.bf16.mxu0 %v3160_v35 }
 0x14a   : > { %2209 = vmatmul.mubr.msk.f32.gmra.mrb[42].mxu0 %vm84_vm4, %v3036_v44  ;;  %2153 = vmatmul.mubr.msk.f32.gmra.mrb[26].mxu1 %vm84_vm4, %v3036_v44 }
 0x14b   : > { %2211 = vmatprep.mubr.msk.f32.mxu0 %vm84_vm4, %v3056_v50  ;;  %2155 = vmatprep.mubr.msk.f32.mxu1 %vm84_vm4, %v3056_v50 }
 0x14c   : > { %2472 = vmatpush3.bf16.msra.mxu1 %v3158_v8  ;;  %2504 = vmatpush3.bf16.msra.mxu0 %v3160_v35 }
 0x14d   : > { %2474 = vmatprep.subr.bf16.mxu1 %v3166_v40  ;;  %2506 = vmatprep.subr.bf16.mxu0 %v3168_v46 }
 0x14e   : > { %2212 = vmatmul.mubr.msk.f32.gmra.mrb[44].mxu0 %vm84_vm4, %v3052_v60  ;;  %2156 = vmatmul.mubr.msk.f32.gmra.mrb[28].mxu1 %vm84_vm4, %v3052_v60 }
 0x14f   : > { %2214 = vmatprep.mubr.msk.f32.mxu0 %vm84_vm4, %v3068_v54  ;;  %2158 = vmatprep.mubr.msk.f32.mxu1 %vm84_vm4, %v3068_v54 }
 0x150   : > { %2476 = vmatpush3.bf16.msra.mxu1 %v3166_v40  ;;  %2508 = vmatpush3.bf16.msra.mxu0 %v3168_v46 }
 0x151   : > { %2478 = vmatprep.subr.bf16.mxu1 %v2477_v42  ;;  %2510 = vmatprep.subr.bf16.mxu0 %v3181_v55 }
 0x152   : > { %2215 = vmatmul.mubr.msk.f32.gmra.mrb[46].mxu0 %vm84_vm4, %v3064_v45  ;;  %2159 = vmatmul.mubr.msk.f32.gmra.mrb[30].mxu1 %vm84_vm4, %v3064_v45 }
 0x154   : > { %2480 = vmatpush3.bf16.msra.mxu1 %v2477_v42  ;;  %2512 = vmatpush3.bf16.msra.mxu0 %v3181_v55 }
 0x155   : > { %2513 = vmatprep.subr.bf16.mxu1 %v3090_v2 }
 0x209   : > { %v2139_v10 = vpop.f32.mrb[16].mxu1  ;;  %v2195_v11 = vpop.f32.mrb[32].mxu0 }
 0x20a   : > { %v3274_v56 = vadd.f32 %v2139_v10, %v3683_v15  ;;  %v3277_v63 = vadd.f32 %v2195_v11, %v3683_v15  ;;  %v762_v33 = vpop.f32.mrb[17].mxu1  ;;  %v1131_v37 = vpop.f32.mrb[33].mxu0 }
 0x20b   : > { %v3282_v53 = vadd.f32 %v1131_v37, %v3684_v14  ;;  %v3292_v60 = vadd.f32 %v762_v33, %v3684_v14 }
 0x20c   : > { %843 = vmax.xlane.f32.xlu1 %v3274_v56  ;;  %1212 = vmax.xlane.f32.xlu0 %v3277_v63 }
 0x20d   : > { %v2142_v43 = vpop.f32.mrb[18].mxu1  ;;  %v2198_v47 = vpop.f32.mrb[34].mxu0 }
 0x20e   : > { %v3285_v58 = vadd.f32 %v2198_v47, %v3680_v19  ;;  %v772_v7 = vpop.f32.mrb[19].mxu1  ;;  %v1141_v36 = vpop.f32.mrb[35].mxu0  ;;  %v3295_v50 = vadd.f32 %v2142_v43, %v3680_v19 }
 0x20f   : > { %v3302_v52 = vadd.f32 %v772_v7, %v3682_v16  ;;  %v3305_v34 = vadd.f32 %v1141_v36, %v3682_v16 }
 0x210   : > { %1216 = vmax.xlane.f32.xlu1 %v3285_v58  ;;  %1210 = vmax.xlane.f32.xlu0 %v3282_v53 }
 0x211   : > { %v2201_v44 = vpop.f32.mrb[36].mxu0  ;;  %v3289_v49 = vpop.f32.mrb[20].mxu1 }
 0x212   : > { %v1151_v45 = vpop.f32.mrb[37].mxu0  ;;  %v782_v54 = vpop.f32.mrb[21].mxu1  ;;  %v3308_v41 = vadd.f32 %v2201_v44, %v3678_v21 }
 0x213   : > { %v3313_v8 = vadd.f32 %v1151_v45, %v3679_v20 }
 0x214   : > { %847 = vmax.xlane.f32.xlu1 %v3295_v50  ;;  %841 = vmax.xlane.f32.xlu0 %v3292_v60 }
 0x215   : > { %v2204_v0 = vpop.f32.mrb[38].mxu0  ;;  %v3299_v17 = vpop.f32.mrb[22].mxu1 }
 0x216   : > { %v1161_v62 = vpop.f32.mrb[39].mxu0  ;;  %v792_v5 = vpop.f32.mrb[23].mxu1  ;;  %v3316_v40 = vadd.f32 %v2204_v0, %v3676_v23 }
 0x217   : > { %v3321_v9 = vadd.f32 %v1161_v62, %v3677_v22 }
 0x218   : > { %1214 = vmax.xlane.f32.xlu1 %v3305_v34  ;;  %845 = vmax.xlane.f32.xlu0 %v3302_v52 }
 0x219   : > { %v2207_v38 = vpop.f32.mrb[40].mxu0  ;;  %v2151_v61 = vpop.f32.mrb[24].mxu1 }
 0x21a   : > { %v1171_v39 = vpop.f32.mrb[41].mxu0  ;;  %v802_v57 = vpop.f32.mrb[25].mxu1  ;;  %v3324_v10 = vadd.f32 %v2207_v38, %v2847_v25  ;;  %v3334_v44 = vadd.f32 %v2151_v61, %v2847_v25 }
 0x21b   : > { %v3329_v11 = vadd.f32 %v1171_v39, %v2842_v24  ;;  %v3337_v45 = vadd.f32 %v802_v57, %v2842_v24 }
 0x21c   : > { %1220 = vmax.xlane.f32.xlu1 %v3308_v41  ;;  %1218 = vmax.xlane.f32.xlu0 %v3313_v8 }
 0x21d   : > { %v2210_v6 = vpop.f32.mrb[42].mxu0  ;;  %v2154_v4 = vpop.f32.mrb[26].mxu1 }
 0x21e   : > { %v1181_v59 = vpop.f32.mrb[43].mxu0  ;;  %v812_v42 = vpop.f32.mrb[27].mxu1  ;;  %v3340_v38 = vadd.f32 %v2210_v6, %v2857_v27  ;;  %v3350_v61 = vadd.f32 %v2154_v4, %v2857_v27 }
 0x21f   : > { %v3345_v39 = vadd.f32 %v1181_v59, %v2852_v26  ;;  %v3353_v57 = vadd.f32 %v812_v42, %v2852_v26  ;;  %v3375_v42 = vadd.f32 %v3289_v49, %v3678_v21  ;;  %v3392_v49 = vadd.f32 %v3299_v17, %v3676_v23 }
 0x220   : > { %1224 = vmax.xlane.f32.xlu1 %v3316_v40  ;;  %1222 = vmax.xlane.f32.xlu0 %v3321_v9 }
 0x221   : > { %v2213_v33 = vpop.f32.mrb[44].mxu0  ;;  %v2157_v37 = vpop.f32.mrb[28].mxu1 }
 0x222   : > { %v1191_v43 = vpop.f32.mrb[45].mxu0  ;;  %v822_v47 = vpop.f32.mrb[29].mxu1  ;;  %v3356_v6 = vadd.f32 %v2213_v33, %v2867_v29  ;;  %v3378_v33 = vadd.f32 %v782_v54, %v3679_v20  ;;  %v3395_v54 = vadd.f32 %v792_v5, %v3677_v22 }
 0x223   : > { %v3361_v59 = vadd.f32 %v1191_v43, %v2862_v28  ;;  %v3383_v43 = vadd.f32 %v2157_v37, %v2867_v29 }
 0x224   : > { %1228 = vmax.xlane.f32.xlu1 %v3324_v10  ;;  %1226 = vmax.xlane.f32.xlu0 %v3329_v11 }
 0x225   : > { %v2216_v7 = vpop.f32.mrb[46].mxu0  ;;  %v2160_v36 = vpop.f32.mrb[30].mxu1 }
 0x226   : > { %v1201_v0 = vpop.f32.mrb[47].mxu0  ;;  %v832_v62 = vpop.f32.mrb[31].mxu1  ;;  %v3364_v12 = vadd.f32 %v2216_v7, %v2877_v31  ;;  %v3386_v7 = vadd.f32 %v822_v47, %v2862_v28  ;;  %v3400_v37 = vadd.f32 %v2160_v36, %v2877_v31 }
 0x227   : > { %v3369_v4 = vadd.f32 %v1201_v0, %v2872_v30  ;;  %v3403_v47 = vadd.f32 %v832_v62, %v2872_v30 }
 0x228   : > { %859 = vmax.xlane.f32.xlu1 %v3334_v44  ;;  %857 = vmax.xlane.f32.xlu0 %v3337_v45 }
 0x22c   : > { %1232 = vmax.xlane.f32.xlu1 %v3340_v38  ;;  %1230 = vmax.xlane.f32.xlu0 %v3345_v39 }
 0x230   : > { %863 = vmax.xlane.f32.xlu1 %v3350_v61  ;;  %861 = vmax.xlane.f32.xlu0 %v3353_v57 }
 0x234   : > { %1236 = vmax.xlane.f32.xlu1 %v3356_v6  ;;  %1234 = vmax.xlane.f32.xlu0 %v3361_v59 }
 0x238   : > { %1240 = vmax.xlane.f32.xlu1 %v3364_v12  ;;  %1238 = vmax.xlane.f32.xlu0 %v3369_v4 }
 0x23c   : > { %851 = vmax.xlane.f32.xlu1 %v3375_v42  ;;  %849 = vmax.xlane.f32.xlu0 %v3378_v33 }
 0x240   : > { %867 = vmax.xlane.f32.xlu1 %v3383_v43  ;;  %865 = vmax.xlane.f32.xlu0 %v3386_v7 }
 0x244   : > { %855 = vmax.xlane.f32.xlu1 %v3392_v49  ;;  %853 = vmax.xlane.f32.xlu0 %v3395_v54 }
 0x248   : > { %871 = vmax.xlane.f32.xlu1 %v3400_v37  ;;  %869 = vmax.xlane.f32.xlu0 %v3403_v47 }
 0x299   : > { %v844_v0 = vpop.xlane.xlu1 %843  ;;  %v1213_v17 = vpop.xlane.xlu0 %1212 }
 0x29a   : > { %v874_v13 = vsub.f32 %v3274_v56, %v844_v0  ;;  %v1243_v5 = vsub.f32 %v3277_v63, %v1213_v17 }
 0x29c   : > { %v1260_v14 = vmul.f32 1.442695, %v1243_v5  ;;  %v891_v18 = vmul.f32 1.442695, %v874_v13 }
 0x29d   : > { %v1217_v15 = vpop.xlane.xlu1 %1216  ;;  %v1211_v16 = vpop.xlane.xlu0 %1210 }
 0x29e   : > { %v1245_v36 = vsub.f32 %v3285_v58, %v1217_v15  ;;  %v1242_v19 = vsub.f32 %v3282_v53, %v1211_v16  ;;  %2554 = vpow2.f32 %v1260_v14 }
 0x29f   : > { %2556 = vpow2.f32 %v891_v18 }
 0x2a0   : > { %v1258_v62 = vmul.f32 1.442695, %v1242_v19  ;;  %v1264_v22 = vmul.f32 1.442695, %v1245_v36 }
 0x2a1   : > { %v848_v20 = vpop.xlane.xlu1 %847  ;;  %v842_v21 = vpop.xlane.xlu0 %841 }
 0x2a2   : > { %v873_v23 = vsub.f32 %v3292_v60, %v842_v21  ;;  %2558 = vpow2.f32 %v1258_v62  ;;  %v876_v56 = vsub.f32 %v3295_v50, %v848_v20 }
 0x2a3   : > { %2560 = vpow2.f32 %v1264_v22 }
 0x2a4   : > { %v889_v63 = vmul.f32 1.442695, %v873_v23  ;;  %v895_v15 = vmul.f32 1.442695, %v876_v56 }
 0x2a5   : > { %v1215_v0 = vpop.xlane.xlu1 %1214  ;;  %v846_v17 = vpop.xlane.xlu0 %845 }
 0x2a6   : > { %v1244_v13 = vsub.f32 %v3305_v34, %v1215_v0  ;;  %2562 = vpow2.f32 %v889_v63  ;;  %v875_v14 = vsub.f32 %v3302_v52, %v846_v17 }
 0x2a8   : > { %v1262_v16 = vmul.f32 1.442695, %v1244_v13  ;;  %v3415_v19 = vpop.eup %2554  ;;  %v893_v21 = vmul.f32 1.442695, %v875_v14 }
 0x2a9   : > { %v1221_v18 = vpop.xlane.xlu1 %1220  ;;  %v1219_v53 = vpop.xlane.xlu0 %1218  ;;  %1292 = vadd.xlane.f32.xlu1 %v3415_v19 }
 0x2aa   : > { %2564 = vpow2.f32 %v1262_v16  ;;  %v1247_v20 = vsub.f32 %v3308_v41, %v1221_v18  ;;  %v1246_v22 = vsub.f32 %v3313_v8, %v1219_v53  ;;  %v3420_v23 = vpop.eup %2556 }
 0x2ab   : > { %2566 = vpow2.f32 %v895_v15 }
 0x2ac   : > { %v1268_v58 = vmul.f32 1.442695, %v1247_v20  ;;  %v3422_v60 = vpop.eup %2558  ;;  %v1266_v41 = vmul.f32 1.442695, %v1246_v22 }
 0x2ad   : > { %v1225_v50 = vpop.xlane.xlu1 %1224  ;;  %v1223_v52 = vpop.xlane.xlu0 %1222  ;;  %923 = vadd.xlane.f32.xlu1 %v3420_v23  ;;  %1290 = vadd.xlane.f32.xlu0 %v3422_v60 }
 0x2ae   : > { %2568 = vpow2.f32 %v1268_v58  ;;  %v1249_v34 = vsub.f32 %v3316_v40, %v1225_v50  ;;  %v1248_v5 = vsub.f32 %v3321_v9, %v1223_v52  ;;  %v3428_v36 = vpop.eup %2560 }
 0x2af   : > { %2570 = vpow2.f32 %v893_v21 }
 0x2b0   : > { %v1272_v8 = vmul.f32 1.442695, %v1249_v34  ;;  %v3430_v62 = vpop.eup %2562  ;;  %v1270_v40 = vmul.f32 1.442695, %v1248_v5 }
 0x2b1   : > { %v1229_v56 = vpop.xlane.xlu1 %1228  ;;  %v1227_v63 = vpop.xlane.xlu0 %1226  ;;  %1296 = vadd.xlane.f32.xlu1 %v3428_v36  ;;  %921 = vadd.xlane.f32.xlu0 %v3430_v62 }
 0x2b2   : > { %2572 = vpow2.f32 %v1272_v8  ;;  %v1251_v0 = vsub.f32 %v3324_v10, %v1229_v56  ;;  %v1250_v17 = vsub.f32 %v3329_v11, %v1227_v63 }
 0x2b3   : > { %2574 = vpow2.f32 %v1266_v41 }
 0x2b4   : > { %v3436_v13 = vpop.eup %2564  ;;  %v1276_v9 = vmul.f32 1.442695, %v1251_v0  ;;  %v1274_v10 = vmul.f32 1.442695, %v1250_v17 }
 0x2b5   : > { %v3438_v15 = vpop.eup %2566  ;;  %v860_v14 = vpop.xlane.xlu1 %859  ;;  %1294 = vadd.xlane.f32.xlu0 %v3436_v13 }
 0x2b6   : > { %v858_v16 = vpop.xlane.xlu0 %857  ;;  %2576 = vpow2.f32 %v1276_v9  ;;  %927 = vadd.xlane.f32.xlu1 %v3438_v15  ;;  %v882_v18 = vsub.f32 %v3334_v44, %v860_v14 }
 0x2b7   : > { %2578 = vpow2.f32 %v1270_v40  ;;  %v881_v53 = vsub.f32 %v3337_v45, %v858_v16 }
 0x2b8   : > { %v3444_v20 = vpop.eup %2568  ;;  %v907_v11 = vmul.f32 1.442695, %v882_v18 }
 0x2b9   : > { %v3446_v21 = vpop.eup %2570  ;;  %v1233_v22 = vpop.xlane.xlu1 %1232  ;;  %v905_v44 = vmul.f32 1.442695, %v881_v53 }
 0x2ba   : > { %v1231_v58 = vpop.xlane.xlu0 %1230  ;;  %2580 = vpow2.f32 %v907_v11  ;;  %1300 = vadd.xlane.f32.xlu1 %v3444_v20  ;;  %v1253_v50 = vsub.f32 %v3340_v38, %v1233_v22  ;;  %925 = vadd.xlane.f32.xlu0 %v3446_v21 }
 0x2bb   : > { %2582 = vpow2.f32 %v1274_v10  ;;  %v1252_v52 = vsub.f32 %v3345_v39, %v1231_v58 }
 0x2bc   : > { %v3452_v34 = vpop.eup %2572  ;;  %v1280_v45 = vmul.f32 1.442695, %v1253_v50 }
 0x2bd   : > { %v3454_v41 = vpop.eup %2574  ;;  %v864_v5 = vpop.xlane.xlu1 %863  ;;  %v1278_v38 = vmul.f32 1.442695, %v1252_v52 }
 0x2be   : > { %v862_v8 = vpop.xlane.xlu0 %861  ;;  %2584 = vpow2.f32 %v1280_v45  ;;  %1304 = vadd.xlane.f32.xlu1 %v3452_v34  ;;  %v884_v56 = vsub.f32 %v3350_v61, %v864_v5  ;;  %1298 = vadd.xlane.f32.xlu0 %v3454_v41 }
 0x2bf   : > { %2586 = vpow2.f32 %v905_v44  ;;  %v883_v63 = vsub.f32 %v3353_v57, %v862_v8 }
 0x2c0   : > { %v3460_v0 = vpop.eup %2576  ;;  %v911_v39 = vmul.f32 1.442695, %v884_v56 }
 0x2c1   : > { %v3462_v40 = vpop.eup %2578  ;;  %v1237_v17 = vpop.xlane.xlu1 %1236  ;;  %v909_v61 = vmul.f32 1.442695, %v883_v63 }
 0x2c2   : > { %v1235_v9 = vpop.xlane.xlu0 %1234  ;;  %2588 = vpow2.f32 %v911_v39  ;;  %1308 = vadd.xlane.f32.xlu1 %v3460_v0  ;;  %v1255_v14 = vsub.f32 %v3356_v6, %v1237_v17  ;;  %1302 = vadd.xlane.f32.xlu0 %v3462_v40 }
 0x2c3   : > { %2590 = vpow2.f32 %v1278_v38  ;;  %v1254_v16 = vsub.f32 %v3361_v59, %v1235_v9 }
 0x2c4   : > { %v3468_v18 = vpop.eup %2580  ;;  %v1284_v57 = vmul.f32 1.442695, %v1255_v14 }
 0x2c5   : > { %v3470_v10 = vpop.eup %2582  ;;  %v1241_v53 = vpop.xlane.xlu1 %1240  ;;  %v1282_v6 = vmul.f32 1.442695, %v1254_v16 }
 0x2c6   : > { %v1239_v11 = vpop.xlane.xlu0 %1238  ;;  %2592 = vpow2.f32 %v1284_v57  ;;  %939 = vadd.xlane.f32.xlu1 %v3468_v18  ;;  %v1257_v22 = vsub.f32 %v3364_v12, %v1241_v53  ;;  %1306 = vadd.xlane.f32.xlu0 %v3470_v10 }
 0x2c7   : > { %2594 = vpow2.f32 %v909_v61  ;;  %v1256_v58 = vsub.f32 %v3369_v4, %v1239_v11 }
 0x2c8   : > { %v3476_v50 = vpop.eup %2584  ;;  %v1288_v59 = vmul.f32 1.442695, %v1257_v22 }
 0x2c9   : > { %v3478_v44 = vpop.eup %2586  ;;  %v852_v52 = vpop.xlane.xlu1 %851  ;;  %v1286_v12 = vmul.f32 1.442695, %v1256_v58 }
 0x2ca   : > { %v850_v45 = vpop.xlane.xlu0 %849  ;;  %2596 = vpow2.f32 %v1288_v59  ;;  %1312 = vadd.xlane.f32.xlu1 %v3476_v50  ;;  %v878_v5 = vsub.f32 %v3375_v42, %v852_v52  ;;  %937 = vadd.xlane.f32.xlu0 %v3478_v44 }
 0x2cb   : > { %2598 = vpow2.f32 %v1282_v6  ;;  %v877_v8 = vsub.f32 %v3378_v33, %v850_v45 }
 0x2cc   : > { %v3484_v56 = vpop.eup %2588  ;;  %v899_v4 = vmul.f32 1.442695, %v878_v5 }
 0x2cd   : > { %v3486_v38 = vpop.eup %2590  ;;  %v868_v63 = vpop.xlane.xlu1 %867  ;;  %v897_v42 = vmul.f32 1.442695, %v877_v8 }
 0x2ce   : > { %v866_v39 = vpop.xlane.xlu0 %865  ;;  %2600 = vpow2.f32 %v899_v4  ;;  %943 = vadd.xlane.f32.xlu1 %v3484_v56  ;;  %v886_v17 = vsub.f32 %v3383_v43, %v868_v63  ;;  %1310 = vadd.xlane.f32.xlu0 %v3486_v38 }
 0x2cf   : > { %2602 = vpow2.f32 %v1286_v12  ;;  %v885_v9 = vsub.f32 %v3386_v7, %v866_v39 }
 0x2d0   : > { %v3492_v14 = vpop.eup %2592  ;;  %v915_v33 = vmul.f32 1.442695, %v886_v17 }
 0x2d1   : > { %v3494_v61 = vpop.eup %2594  ;;  %v856_v16 = vpop.xlane.xlu1 %855  ;;  %v913_v43 = vmul.f32 1.442695, %v885_v9 }
 0x2d2   : > { %v854_v57 = vpop.xlane.xlu0 %853  ;;  %2604 = vpow2.f32 %v915_v33  ;;  %1316 = vadd.xlane.f32.xlu1 %v3492_v14  ;;  %v880_v53 = vsub.f32 %v3392_v49, %v856_v16  ;;  %941 = vadd.xlane.f32.xlu0 %v3494_v61 }
 0x2d3   : > { %2606 = vpow2.f32 %v897_v42  ;;  %v879_v11 = vsub.f32 %v3395_v54, %v854_v57 }
 0x2d4   : > { %v3500_v22 = vpop.eup %2596  ;;  %v903_v7 = vmul.f32 1.442695, %v880_v53 }
 0x2d5   : > { %v3502_v6 = vpop.eup %2598  ;;  %v872_v58 = vpop.xlane.xlu1 %871  ;;  %v901_v49 = vmul.f32 1.442695, %v879_v11 }
 0x2d6   : > { %v870_v59 = vpop.xlane.xlu0 %869  ;;  %2608 = vpow2.f32 %v903_v7  ;;  %1320 = vadd.xlane.f32.xlu1 %v3500_v22  ;;  %v888_v52 = vsub.f32 %v3400_v37, %v872_v58  ;;  %1314 = vadd.xlane.f32.xlu0 %v3502_v6 }
 0x2d7   : > { %2610 = vpow2.f32 %v913_v43  ;;  %v887_v45 = vsub.f32 %v3403_v47, %v870_v59 }
 0x2d8   : > { %v3508_v5 = vpop.eup %2600  ;;  %v919_v54 = vmul.f32 1.442695, %v888_v52 }
 0x2d9   : > { %v3510_v12 = vpop.eup %2602  ;;  %v917_v8 = vmul.f32 1.442695, %v887_v45 }
 0x2da   : > { %2612 = vpow2.f32 %v919_v54  ;;  %931 = vadd.xlane.f32.xlu1 %v3508_v5  ;;  %1318 = vadd.xlane.f32.xlu0 %v3510_v12 }
 0x2db   : > { %2614 = vpow2.f32 %v901_v49 }
 0x2dc   : > { %v3514_v4 = vpop.eup %2604  ;;  %2616 = vpow2.f32 %v917_v8 }
 0x2dd   : > { %v3516_v37 = vpop.eup %2606 }
 0x2de   : > { %947 = vadd.xlane.f32.xlu1 %v3514_v4  ;;  %929 = vadd.xlane.f32.xlu0 %v3516_v37 }
 0x2e0   : > { %v3520_v47 = vpop.eup %2608 }
 0x2e1   : > { %v3522_v63 = vpop.eup %2610 }
 0x2e2   : > { %935 = vadd.xlane.f32.xlu1 %v3520_v47  ;;  %945 = vadd.xlane.f32.xlu0 %v3522_v63 }
 0x2e4   : > { %v3526_v39 = vpop.eup %2612 }
 0x2e5   : > { %v3528_v17 = vpop.eup %2614 }
 0x2e6   : > { %951 = vadd.xlane.f32.xlu1 %v3526_v39  ;;  %933 = vadd.xlane.f32.xlu0 %v3528_v17  ;;  %v3532_v42 = vpop.eup %2616 }
 0x2ea   : > { %949 = vadd.xlane.f32.xlu0 %v3532_v42 }
 0x336   : > { %v1293_v9 = vpop.xlane.xlu1 %1292 }
 0x337   : > { %2618 = vrcp.f32 %v1293_v9 }
 0x33a   : > { %v924_v33 = vpop.xlane.xlu1 %923  ;;  %v1291_v16 = vpop.xlane.xlu0 %1290 }
 0x33b   : > { %2620 = vrcp.f32 %v1291_v16 }
 0x33c   : > { %2622 = vrcp.f32 %v924_v33 }
 0x33e   : > { %v1297_v57 = vpop.xlane.xlu1 %1296  ;;  %v922_v53 = vpop.xlane.xlu0 %921 }
 0x33f   : > { %2624 = vrcp.f32 %v922_v53 }
 0x340   : > { %2626 = vrcp.f32 %v1297_v57 }
 0x341   : > { %v2619_v7 = vpop.eup %2618 }
 0x342   : > { %v1295_v11 = vpop.xlane.xlu0 %1294  ;;  %v1339_v45 = vmul.f32 %v2619_v7, %v3415_v19 }
 0x343   : > { %v928_v43 = vpop.xlane.xlu1 %927  ;;  %2628 = vrcp.f32 %v1295_v11 }
 0x344   : > { %2630 = vrcp.f32 %v928_v43 }
 0x345   : > { %v2621_v58 = vpop.eup %2620 }
 0x346   : > { %v1338_v49 = vmul.f32 %v2621_v58, %v3422_v60  ;;  %v2623_v54 = vpop.eup %2622 }
 0x347   : > { %v1301_v59 = vpop.xlane.xlu1 %1300  ;;  %v926_v52 = vpop.xlane.xlu0 %925  ;;  %v970_v57 = vmul.f32 %v2623_v54, %v3420_v23 }
 0x348   : > { %2632 = vrcp.f32 %v926_v52  ;;  %2249 = vmatprep.mubr.f32.mxu1 %v1338_v49 }
 0x349   : > { %v2625_v8 = vpop.eup %2624  ;;  %2250 = vmatmul.mubr.f32.vlgmr.msra.gmra.mrb[32].mxu1 %v1339_v45  ;;  %2634 = vrcp.f32 %v1301_v59 }
 0x34a   : > { %2521 = vmatpush3.bf16.msra.mxu1 %v3090_v2  ;;  %v969_v16 = vmul.f32 %v2625_v8, %v3430_v62  ;;  %v2627_v60 = vpop.eup %2626 }
 0x34b   : > { %v1305_v9 = vpop.xlane.xlu1 %1304  ;;  %v1299_v33 = vpop.xlane.xlu0 %1298  ;;  %2514 = vmatprep.subr.bf16.mxu1 %v3106_v3  ;;  %v1341_v2 = vmul.f32 %v2627_v60, %v3428_v36 }
 0x34c   : > { %2636 = vrcp.f32 %v1299_v33  ;;  %2305 = vmatprep.mubr.f32.mxu0 %v969_v16 }
 0x34d   : > { %v2629_v19 = vpop.eup %2628  ;;  %2306 = vmatmul.mubr.f32.vlgmr.msra.gmra.mrb[48].mxu0 %v970_v57  ;;  %2638 = vrcp.f32 %v1305_v9 }
 0x34e   : > { %2522 = vmatpush3.bf16.msra.mxu1 %v3106_v3  ;;  %v1340_v11 = vmul.f32 %v2629_v19, %v3436_v13  ;;  %v2631_v23 = vpop.eup %2630 }
 0x34f   : > { %v1309_v53 = vpop.xlane.xlu1 %1308  ;;  %v1303_v43 = vpop.xlane.xlu0 %1302  ;;  %2515 = vmatprep.subr.bf16.mxu1 %v3114_v48  ;;  %v972_v3 = vmul.f32 %v2631_v23, %v3438_v15 }
 0x350   : > { %2640 = vrcp.f32 %v1303_v43  ;;  %2252 = vmatprep.mubr.f32.mxu1 %v1340_v11 }
 0x351   : > { %2253 = vmatmul.mubr.f32.gmra.mrb[34].mxu1 %v1341_v2  ;;  %2642 = vrcp.f32 %v1309_v53 }
 0x352   : > { %v2633_v62 = vpop.eup %2632  ;;  %2523 = vmatpush3.bf16.msra.mxu1 %v3114_v48 }
 0x353   : > { %v940_v7 = vpop.xlane.xlu1 %939  ;;  %v1307_v58 = vpop.xlane.xlu0 %1306  ;;  %v971_v59 = vmul.f32 %v2633_v62, %v3446_v21  ;;  %2516 = vmatprep.subr.bf16.mxu1 %v3132_v51 }
 0x354   : > { %2644 = vrcp.f32 %v1307_v58  ;;  %v2635_v13 = vpop.eup %2634 }
 0x355   : > { %2308 = vmatprep.mubr.f32.mxu0 %v971_v59  ;;  %v1343_v48 = vmul.f32 %v2635_v13, %v3444_v20 }
 0x356   : > { %v2637_v52 = vpop.eup %2636  ;;  %2309 = vmatmul.mubr.f32.gmra.mrb[50].mxu0 %v972_v3  ;;  %2524 = vmatpush3.bf16.msra.mxu1 %v3132_v51 }
 0x357   : > { %v1313_v36 = vpop.xlane.xlu1 %1312  ;;  %v938_v49 = vpop.xlane.xlu0 %937  ;;  %v1342_v45 = vmul.f32 %v2637_v52, %v3454_v41  ;;  %2517 = vmatprep.subr.bf16.mxu1 %v3140_v1 }
 0x358   : > { %v2639_v21 = vpop.eup %2638  ;;  %2646 = vrcp.f32 %v1313_v36 }
 0x359   : > { %2255 = vmatprep.mubr.f32.mxu1 %v1342_v45  ;;  %v1345_v51 = vmul.f32 %v2639_v21, %v3452_v34 }
 0x35a   : > { %v2641_v54 = vpop.eup %2640  ;;  %2256 = vmatmul.mubr.f32.gmra.mrb[36].mxu1 %v1343_v48 }
 0x35b   : > { %v944_v8 = vpop.xlane.xlu1 %943  ;;  %v1311_v15 = vpop.xlane.xlu0 %1310  ;;  %2525 = vmatpush3.bf16.msra.mxu1 %v3140_v1  ;;  %v1344_v9 = vmul.f32 %v2641_v54, %v3462_v40 }
 0x35c   : > { %2648 = vrcp.f32 %v1311_v15  ;;  %2518 = vmatprep.subr.bf16.mxu1 %v3160_v35  ;;  %v2643_v41 = vpop.eup %2642 }
 0x35d   : > { %2258 = vmatprep.mubr.f32.mxu1 %v1344_v9  ;;  %v1347_v1 = vmul.f32 %v2643_v41, %v3460_v0 }
 0x35e   : > { %v2645_v33 = vpop.eup %2644  ;;  %2259 = vmatmul.mubr.f32.gmra.mrb[38].mxu1 %v1345_v51 }
 0x35f   : > { %v1317_v20 = vpop.xlane.xlu1 %1316  ;;  %v942_v16 = vpop.xlane.xlu0 %941  ;;  %2526 = vmatpush3.bf16.msra.mxu1 %v3160_v35  ;;  %v1346_v57 = vmul.f32 %v2645_v33, %v3470_v10 }
 0x360   : > { %2519 = vmatprep.subr.bf16.mxu1 %v3168_v46  ;;  %2650 = vrcp.f32 %v1317_v20 }
 0x361   : > { %2261 = vmatprep.mubr.f32.mxu1 %v1346_v57 }
 0x362   : > { %2262 = vmatmul.mubr.f32.gmra.mrb[40].mxu1 %v1347_v1  ;;  %v2647_v34 = vpop.eup %2646 }
 0x363   : > { %v1321_v40 = vpop.xlane.xlu1 %1320  ;;  %v1315_v60 = vpop.xlane.xlu0 %1314  ;;  %2527 = vmatpush3.bf16.msra.mxu1 %v3168_v46  ;;  %v1349_v10 = vmul.f32 %v2647_v34, %v3476_v50 }
 0x364   : > { %2652 = vrcp.f32 %v1315_v60  ;;  %2520 = vmatprep.subr.bf16.mxu1 %v3181_v55 }
 0x365   : > { %2654 = vrcp.f32 %v938_v49 }
 0x366   : > { %v2649_v19 = vpop.eup %2648  ;;  %2656 = vrcp.f32 %v1321_v40 }
 0x367   : > { %v932_v35 = vpop.xlane.xlu1 %931  ;;  %v1319_v53 = vpop.xlane.xlu0 %1318  ;;  %2528 = vmatpush3.bf16.msra.mxu1 %v3181_v55  ;;  %v1348_v0 = vmul.f32 %v2649_v19, %v3486_v38 }
 0x368   : > { %2658 = vrcp.f32 %v1319_v53 }
 0x369   : > { %2660 = vrcp.f32 %v940_v7  ;;  %2264 = vmatprep.mubr.f32.mxu1 %v1348_v0 }
 0x36a   : > { %2662 = vrcp.f32 %v942_v16  ;;  %2265 = vmatmul.mubr.f32.gmra.mrb[42].mxu1 %v1349_v10  ;;  %v2651_v11 = vpop.eup %2650 }
 0x36b   : > { %v948_v46 = vpop.xlane.xlu1 %947  ;;  %v930_v43 = vpop.xlane.xlu0 %929  ;;  %2664 = vrcp.f32 %v932_v35  ;;  %v1351_v38 = vmul.f32 %v2651_v11, %v3492_v14  ;;  %v2684_v11 = vld [vmem:[%s2900_s21 + $0x18] sm:$0xff] }
 0x36c   : > { %2666 = vrcp.f32 %v930_v43 }
 0x36d   : > { %2668 = vrcp.f32 %v944_v8 }
 0x36e   : > { %v2653_v2 = vpop.eup %2652 }
 0x36f   : > { %v936_v23 = vpop.xlane.xlu1 %935  ;;  %v946_v62 = vpop.xlane.xlu0 %945  ;;  %v1350_v55 = vmul.f32 %v2653_v2, %v3502_v6 }
 0x370   : > { %v2655_v58 = vpop.eup %2654  ;;  %2670 = vrcp.f32 %v946_v62 }
 0x371   : > { %v2657_v50 = vpop.eup %2656  ;;  %2267 = vmatprep.mubr.f32.mxu1 %v1350_v55  ;;  %2672 = vrcp.f32 %v948_v46  ;;  %v977_v45 = vmul.f32 %v2655_v58, %v3478_v44 }
 0x372   : > { %v2659_v7 = vpop.eup %2658  ;;  %2268 = vmatmul.mubr.f32.gmra.mrb[44].mxu1 %v1351_v38  ;;  %2674 = vrcp.f32 %v936_v23  ;;  %v1353_v49 = vmul.f32 %v2657_v50, %v3500_v22  ;;  %v2685_v23 = vld [vmem:[%s2900_s21 + $0x10] sm:$0xff] }
 0x373   : > { %v934_v59 = vpop.xlane.xlu0 %933  ;;  %v2661_v3 = vpop.eup %2660  ;;  %v1352_v52 = vmul.f32 %v2659_v7, %v3510_v12 }
 0x374   : > { %v952_v13 = vpop.xlane.xlu1 %951  ;;  %v2663_v36 = vpop.eup %2662  ;;  %2676 = vrcp.f32 %v934_v59  ;;  %v978_v54 = vmul.f32 %v2661_v3, %v3468_v18 }
 0x375   : > { %v2665_v6 = vpop.eup %2664  ;;  %2270 = vmatprep.mubr.f32.mxu1 %v1352_v52  ;;  %2678 = vrcp.f32 %v952_v13  ;;  %v979_v22 = vmul.f32 %v2663_v36, %v3494_v61  ;;  %v2686_v36 = vld [vmem:[%s2900_s21 + $0x48] sm:$0xff] }
 0x376   : > { %v2667_v14 = vpop.eup %2666  ;;  %2271 = vmatmul.mubr.f32.gmra.mrb[46].mxu1 %v1353_v49  ;;  %v974_v12 = vmul.f32 %v2665_v6, %v3508_v5 }
 0x377   : > { %v950_v48 = vpop.xlane.xlu0 %949  ;;  %2317 = vmatprep.mubr.f32.mxu1 %v977_v45  ;;  %v973_v21 = vmul.f32 %v2667_v14, %v3516_v37  ;;  %v2669_v8 = vpop.eup %2668 }
 0x378   : > { %2680 = vrcp.f32 %v950_v48  ;;  %v980_v9 = vmul.f32 %v2669_v8, %v3484_v56  ;;  %v2687_v48 = vld [vmem:[%s2900_s21 + $0x40] sm:$0xff] }
 0x379   : > { %2311 = vmatprep.mubr.f32.mxu0 %v973_v21 }
 0x37a   : > { %v2671_v15 = vpop.eup %2670  ;;  %2312 = vmatmul.mubr.f32.gmra.mrb[52].mxu0 %v974_v12  ;;  %2318 = vmatmul.mubr.f32.vlgmr.msra.gmra.mrb[40].mxu1 %v978_v54  ;;  %v2688_v54 = vld [vmem:[%s2900_s21 + $0x28] sm:$0xff] }
 0x37b   : > { %2320 = vmatprep.mubr.f32.mxu1 %v979_v22  ;;  %v2673_v44 = vpop.eup %2672  ;;  %v981_v41 = vmul.f32 %v2671_v15, %v3522_v63  ;;  %v2689_v22 = vld [vmem:[%s2900_s21 + $0x20] sm:$0xff] }
 0x37c   : > { %v2675_v51 = vpop.eup %2674  ;;  %v982_v61 = vmul.f32 %v2673_v44, %v3514_v4  ;;  %v2682_v4 = vld [vmem:[%s2900_s21 + $0x8] sm:$0xff] }
 0x37d   : > { %v976_v37 = vmul.f32 %v2675_v51, %v3520_v47 }
 0x37e   : > { %v2677_v33 = vpop.eup %2676  ;;  %2321 = vmatmul.mubr.f32.gmra.mrb[42].mxu1 %v980_v9 }
 0x37f   : > { %2323 = vmatprep.mubr.f32.mxu1 %v981_v41  ;;  %v975_v18 = vmul.f32 %v2677_v33, %v3528_v17  ;;  %v2679_v5 = vpop.eup %2678  ;;  %v2690_v41 = vld [vmem:[%s2900_s21 + $0x58] sm:$0xff] }
 0x380   : > { %v984_v63 = vmul.f32 %v2679_v5, %v3526_v39  ;;  %v2683_v39 = vld [vmem:[%s2900_s21] sm:$0xff] }
 0x381   : > { %2314 = vmatprep.mubr.f32.mxu0 %v975_v18 }
 0x382   : > { %v2681_v20 = vpop.eup %2680  ;;  %2315 = vmatmul.mubr.f32.gmra.mrb[54].mxu0 %v976_v37  ;;  %2324 = vmatmul.mubr.f32.gmra.mrb[44].mxu1 %v982_v61  ;;  %v2691_v37 = vld [vmem:[%s2900_s21 + $0x50] sm:$0xff] }
 0x383   : > { %v983_v56 = vmul.f32 %v2681_v20, %v3532_v42 }
 0x385   : > { %2326 = vmatprep.mubr.f32.mxu1 %v983_v56 }
 0x386   : > { %2327 = vmatmul.mubr.f32.gmra.mrb[46].mxu1 %v984_v63 }
 0x41c   : > { %v2251_v16 = vpop.f32.mrb[32].mxu1 }
 0x41d   : > { %v1420_v17 = vpop.f32.mrb[33].mxu1 }
 0x420   : > { %v2307_v57 = vpop.f32.mrb[48].mxu0 }
 0x421   : > { %v1571_v1 = vadd.f32 %v2307_v57, %v2251_v16  ;;  %v1565_v47 = vpop.f32.mrb[49].mxu0  ;;  %v2692_v57 = vld [vmem:[%s2900_s21 + $0x68] sm:$0xff] }
 0x422   : > { %v1566_v40 = vadd.f32 %v1565_v47, %v1420_v17 }
 0x423   : > { %v1645_v60 = vadd.f32 %v2682_v4, %v1571_v1 }
 0x424   : > { %v1644_v42 = vadd.f32 %v2683_v39, %v1566_v40  ;;  %v2254_v34 = vpop.f32.mrb[34].mxu1 }
 0x425   : > { %v1661_v19 = vmax.f32 %v1645_v60, 0.0  ;;  %v1430_v35 = vpop.f32.mrb[35].mxu1  ;;  %v2693_v60 = vld [vmem:[%s2900_s21 + $0x60] sm:$0xff] }
 0x426   : > { %v1660_v53 = vmax.f32 %v1644_v42, 0.0  ;;  %v2694_v42 = vld [vmem:[%s2900_s21 + $0x38] sm:$0xff] }
 0x427   : > { %1678 = vst.msk [vmem:[%s3588_s24 + $0x8] sm:$0xff] %vm84_vm4, %v1661_v19 }
 0x428   : > { %1677 = vst.msk [vmem:[%s3588_s24] sm:$0xff] %vm84_vm4, %v1660_v53 }
 0x429   : > { %v2310_v0 = vpop.f32.mrb[50].mxu0 }
 0x42a   : > { %v1581_v10 = vadd.f32 %v2310_v0, %v2254_v34  ;;  %v1575_v46 = vpop.f32.mrb[51].mxu0 }
 0x42b   : > { %v1576_v43 = vadd.f32 %v1575_v46, %v1430_v35  ;;  %v2695_v35 = vld [vmem:[%s2900_s21 + $0x30] sm:$0xff] }
 0x42c   : > { %v1647_v2 = vadd.f32 %v2684_v11, %v1581_v10 }
 0x42d   : > { %v1646_v62 = vadd.f32 %v2685_v23, %v1576_v43  ;;  %v2257_v55 = vpop.f32.mrb[36].mxu1  ;;  %v2696_v43 = vld [vmem:[%s2900_s21 + $0x78] sm:$0xff] }
 0x42e   : > { %v1663_v58 = vmax.f32 %v1647_v2, 0.0  ;;  %v1440_v38 = vpop.f32.mrb[37].mxu1 }
 0x42f   : > { %v1662_v50 = vmax.f32 %v1646_v62, 0.0  ;;  %v2697_v62 = vld [vmem:[%s2900_s21 + $0x70] sm:$0xff] }
 0x430   : > { %1680 = vst.msk [vmem:[%s3588_s24 + $0x18] sm:$0xff] %vm84_vm4, %v1663_v58 }
 0x431   : > { %1679 = vst.msk [vmem:[%s3588_s24 + $0x10] sm:$0xff] %vm84_vm4, %v1662_v50  ;;  %v2260_v7 = vpop.f32.mrb[38].mxu1 }
 0x432   : > { %v1450_v59 = vpop.f32.mrb[39].mxu1 }
 0x44d   : > { %v2313_v3 = vpop.f32.mrb[52].mxu0  ;;  %v2319_v13 = vpop.f32.mrb[40].mxu1 }
 0x44e   : > { %v1591_v52 = vadd.f32 %v2313_v3, %v2257_v55  ;;  %v1653_v49 = vadd.f32 %v2686_v36, %v2319_v13  ;;  %v1585_v6 = vpop.f32.mrb[53].mxu0  ;;  %v1605_v45 = vpop.f32.mrb[41].mxu1 }
 0x44f   : > { %v1586_v14 = vadd.f32 %v1585_v6, %v1440_v38  ;;  %v1652_v21 = vadd.f32 %v2687_v48, %v1605_v45 }
 0x450   : > { %v1649_v12 = vadd.f32 %v2688_v54, %v1591_v52  ;;  %v1669_v8 = vmax.f32 %v1653_v49, 0.0 }
 0x451   : > { %v1648_v15 = vadd.f32 %v2689_v22, %v1586_v14  ;;  %v1668_v44 = vmax.f32 %v1652_v21, 0.0  ;;  %v2322_v9 = vpop.f32.mrb[42].mxu1 }
 0x452   : > { %v1665_v51 = vmax.f32 %v1649_v12, 0.0  ;;  %1686 = vst.msk [vmem:[%s3588_s24 + $0x48] sm:$0xff] %vm84_vm4, %v1669_v8  ;;  %v1655_v33 = vadd.f32 %v2690_v41, %v2322_v9  ;;  %v1615_v18 = vpop.f32.mrb[43].mxu1 }
 0x453   : > { %v1664_v5 = vmax.f32 %v1648_v15, 0.0  ;;  %1685 = vst.msk [vmem:[%s3588_s24 + $0x40] sm:$0xff] %vm84_vm4, %v1668_v44  ;;  %v1654_v61 = vadd.f32 %v2691_v37, %v1615_v18 }
 0x454   : > { %1682 = vst.msk [vmem:[%s3588_s24 + $0x28] sm:$0xff] %vm84_vm4, %v1665_v51  ;;  %v1671_v20 = vmax.f32 %v1655_v33, 0.0 }
 0x455   : > { %1681 = vst.msk [vmem:[%s3588_s24 + $0x20] sm:$0xff] %vm84_vm4, %v1664_v5  ;;  %v1670_v56 = vmax.f32 %v1654_v61, 0.0  ;;  %v2316_v63 = vpop.f32.mrb[54].mxu0  ;;  %v2325_v16 = vpop.f32.mrb[44].mxu1 }
 0x456   : > { %1688 = vst.msk [vmem:[%s3588_s24 + $0x58] sm:$0xff] %vm84_vm4, %v1671_v20  ;;  %v1601_v17 = vadd.f32 %v2316_v63, %v2260_v7  ;;  %v1657_v1 = vadd.f32 %v2692_v57, %v2325_v16  ;;  %v1595_v47 = vpop.f32.mrb[55].mxu0  ;;  %v1625_v40 = vpop.f32.mrb[45].mxu1 }
 0x457   : > { %1687 = vst.msk [vmem:[%s3588_s24 + $0x50] sm:$0xff] %vm84_vm4, %v1670_v56  ;;  %v1596_v4 = vadd.f32 %v1595_v47, %v1450_v59  ;;  %v1656_v39 = vadd.f32 %v2693_v60, %v1625_v40 }
 0x458   : > { %v1651_v34 = vadd.f32 %v2694_v42, %v1601_v17  ;;  %v1673_v19 = vmax.f32 %v1657_v1, 0.0 }
 0x459   : > { %v1650_v53 = vadd.f32 %v2695_v35, %v1596_v4  ;;  %v1672_v0 = vmax.f32 %v1656_v39, 0.0  ;;  %v2328_v10 = vpop.f32.mrb[46].mxu1  ;;  %64 = sbr.rel (!%p62_p0) target bundleno = 15 (0xf), region = 49 }
 0x45a   : > { %v1667_v46 = vmax.f32 %v1651_v34, 0.0  ;;  %1690 = vst.msk [vmem:[%s3588_s24 + $0x68] sm:$0xff] %vm84_vm4, %v1673_v19  ;;  %v1659_v11 = vadd.f32 %v2696_v43, %v2328_v10  ;;  %v1635_v2 = vpop.f32.mrb[47].mxu1 }
 0x45b   : > { %v1666_v23 = vmax.f32 %v1650_v53, 0.0  ;;  %1689 = vst.msk [vmem:[%s3588_s24 + $0x60] sm:$0xff] %vm84_vm4, %v1672_v0  ;;  %v1658_v55 = vadd.f32 %v2697_v62, %v1635_v2 }
 0x45c   : > { %1684 = vst.msk [vmem:[%s3588_s24 + $0x38] sm:$0xff] %vm84_vm4, %v1667_v46  ;;  %v1675_v58 = vmax.f32 %v1659_v11, 0.0 }
 0x45d   : > { %1683 = vst.msk [vmem:[%s3588_s24 + $0x30] sm:$0xff] %vm84_vm4, %v1666_v23  ;;  %v1674_v38 = vmax.f32 %v1658_v55, 0.0 }
 0x45e   : > { %1692 = vst.msk [vmem:[%s3588_s24 + $0x78] sm:$0xff] %vm84_vm4, %v1675_v58 }
 0x45f   : > { %1691 = vst.msk [vmem:[%s3588_s24 + $0x70] sm:$0xff] %vm84_vm4, %v1674_v38 }

</bundles_post_ra>
